<compile_context>
chip_gen: v7x
topology: tpu7x:2x2x1
jax: 0.10.0
libtpu: 0.0.40
codegen_flags: <defaults>
</compile_context>

<pallas_src>
import functools

import jax
import jax.numpy as jnp
from jax.experimental import pallas as pl
from jax.experimental.pallas import tpu as pltpu

LN_EPS = 1e-5                       # PyTorch nn.LayerNorm default
_INV_SQRT2 = 0.7071067811865476


def _gelu_exact(x):
    # PyTorch nn.GELU() default = exact (erf-based) GELU.
    return 0.5 * x * (1.0 + jax.lax.erf(x * _INV_SQRT2))


def _layernorm_fused(x, gamma, beta):
    # Single-pass LayerNorm over the last axis (biased variance, as PyTorch).
    mean = jnp.mean(x, axis=-1, keepdims=True)
    mean_sq = jnp.mean(x * x, axis=-1, keepdims=True)
    var = mean_sq - mean * mean
    inv = jax.lax.rsqrt(var + LN_EPS)
    return (x - mean) * inv * gamma + beta


def mixer_block_kernel(
    x_ref,                    # (Bt, S, D)
    g0_ref, b0_ref,           # LayerNorm_0 gamma/beta           (1, D)
    tw1_ref, tb1_ref,         # token Dense_0: W (Tm, S), b (1, Tm)  [PyTorch layout]
    tw2_ref, tb2_ref,         # token Dense_1: W (S, Tm), b (1, S)   [PyTorch layout]
    g1_ref, b1_ref,           # LayerNorm_1 gamma/beta           (1, D)
    cw1_ref, cb1_ref,         # channel Dense_0: W (D, Cm), b (1, Cm)
    cw2_ref, cb2_ref,         # channel Dense_1: W (Cm, D), b (1, D)
    o_ref,                    # (Bt, S, D)
    *,
    compute_dtype,
):
    x = x_ref[...].astype(jnp.float32)            # (Bt, S, D), f32 residual path
    bt, s, d = x.shape

    # ---- LayerNorm_0 + token mixing (MLP over the token axis) ----
    y = _layernorm_fused(x, g0_ref[0], b0_ref[0]).astype(compute_dtype)
    tw1 = tw1_ref[...].astype(compute_dtype)      # (Tm, S)
    tw2 = tw2_ref[...].astype(compute_dtype)      # (S, Tm)
    tb1 = tb1_ref[0][:, None]                     # (Tm, 1), f32
    tb2 = tb2_ref[0][:, None]                     # (S, 1),  f32

    x_tok = []
    for bi in range(bt):                          # bt is static -> unrolled
        # h = W1 @ y_b contracts the token axis: no activation transpose needed.
        h = jnp.dot(tw1, y[bi], preferred_element_type=jnp.float32) + tb1  # (Tm, D)
        h = _gelu_exact(h).astype(compute_dtype)
        z = jnp.dot(tw2, h, preferred_element_type=jnp.float32) + tb2      # (S, D)
        x_tok.append(x[bi] + z)                   # residual, already (S, D)
    x = jnp.stack(x_tok, axis=0)                  # (Bt, S, D)

    # ---- LayerNorm_1 + channel mixing (MLP over the hidden axis) ----
    y = _layernorm_fused(x, g1_ref[0], b1_ref[0])
    y2 = y.reshape(bt * s, d).astype(compute_dtype)       # one big matmul (M = Bt*S)
    cw1 = cw1_ref[...].astype(compute_dtype)               # (D, Cm)
    cw2 = cw2_ref[...].astype(compute_dtype)               # (Cm, D)
    h = jnp.dot(y2, cw1, preferred_element_type=jnp.float32) + cb1_ref[0]   # (Bt*S, Cm)
    h = _gelu_exact(h).astype(compute_dtype)
    z = jnp.dot(h, cw2, preferred_element_type=jnp.float32) + cb2_ref[0]    # (Bt*S, D)
    o_ref[...] = (x + z.reshape(bt, s, d)).astype(o_ref.dtype)


def _pick_block_b(batch, max_block=8):
    """Largest divisor of `batch` (<= max_block) that still leaves >= 2 grid
    steps, so both v7x TensorCores get work while amortizing per-step cost."""
    best = 1
    for cand in range(1, min(batch, max_block) + 1):
        if batch % cand == 0 and (batch == 1 or batch // cand >= 2):
            best = cand
    return best


@functools.partial(jax.jit, static_argnames=("block_b", "compute_dtype"))
def _mixer_block_call(x, g0, b0, tw1, tb1, tw2, tb2, g1, b1,
                      cw1, cb1, cw2, cb2, *, block_b, compute_dtype):
    B, S, D = x.shape
    Tm = tw1.shape[0]
    Cm = cw1.shape[1]

    def full(shape):
        nd = len(shape)
        return pl.BlockSpec(shape, lambda b, _nd=nd: (0,) * _nd)

    kernel = functools.partial(mixer_block_kernel, compute_dtype=compute_dtype)

    return pl.pallas_call(
        kernel,
        out_shape=jax.ShapeDtypeStruct((B, S, D), x.dtype),
        grid_spec=pltpu.PrefetchScalarGridSpec(
            num_scalar_prefetch=0,
            grid=(B // block_b,),
            in_specs=[
                pl.BlockSpec((block_b, S, D), lambda b: (b, 0, 0)),   # x
                full((1, D)), full((1, D)),                           # LN0 gamma/beta
                full((Tm, S)), full((1, Tm)),                         # token W1, b1
                full((S, Tm)), full((1, S)),                          # token W2, b2
                full((1, D)), full((1, D)),                           # LN1 gamma/beta
                full((D, Cm)), full((1, Cm)),                         # channel W1, b1
                full((Cm, D)), full((1, D)),                          # channel W2, b2
            ],
            out_specs=pl.BlockSpec((block_b, S, D), lambda b: (b, 0, 0)),
        ),
        compiler_params=pltpu.CompilerParams(
            dimension_semantics=("parallel",),
            # Let larger D/Cm configs keep all four MLP weights resident
            # (128 MiB physical on v5e/v6e; 64 MiB is still within v7x VMEM).
            vmem_limit_bytes=64 * 1024 * 1024,
        ),
    )(x, g0, b0, tw1, tb1, tw2, tb2, g1, b1, cw1, cb1, cw2, cb2)


def mixer_block(x, params, *, block_b=None, compute_dtype=jnp.bfloat16):
    if block_b is None:
        block_b = _pick_block_b(x.shape[0])
    assert x.shape[0] % block_b == 0, "batch must be divisible by block_b"
    return _mixer_block_call(
        x,
        params["g0"], params["b0"],
        params["tw1"], params["tb1"], params["tw2"], params["tb2"],
        params["g1"], params["b1"],
        params["cw1"], params["cb1"], params["cw2"], params["cb2"],
        block_b=block_b, compute_dtype=compute_dtype)


def init_params(key, num_tokens, hidden_dim, tokens_mlp_dim, channels_mlp_dim):
    ks = jax.random.split(key, 8)
    scale = 0.02
    return {
        # LayerNorms: PyTorch init is ones / zeros
        "g0": jnp.ones((1, hidden_dim), jnp.float32),
        "b0": jnp.zeros((1, hidden_dim), jnp.float32),
        "g1": jnp.ones((1, hidden_dim), jnp.float32),
        "b1": jnp.zeros((1, hidden_dim), jnp.float32),
        # token_mixing weights in PyTorch (out, in) orientation:
        #   Dense_0: Linear(num_tokens -> tokens_mlp_dim)  -> (Tm, S)
        #   Dense_1: Linear(tokens_mlp_dim -> num_tokens)  -> (S, Tm)
        "tw1": scale * jax.random.normal(ks[0], (tokens_mlp_dim, num_tokens), jnp.float32),
        "tb1": scale * jax.random.normal(ks[1], (1, tokens_mlp_dim), jnp.float32),
        "tw2": scale * jax.random.normal(ks[2], (num_tokens, tokens_mlp_dim), jnp.float32),
        "tb2": scale * jax.random.normal(ks[3], (1, num_tokens), jnp.float32),
        # channel_mixing weights in (in, out) orientation (used as y @ W):
        "cw1": scale * jax.random.normal(ks[4], (hidden_dim, channels_mlp_dim), jnp.float32),
        "cb1": scale * jax.random.normal(ks[5], (1, channels_mlp_dim), jnp.float32),
        "cw2": scale * jax.random.normal(ks[6], (channels_mlp_dim, hidden_dim), jnp.float32),
        "cb2": scale * jax.random.normal(ks[7], (1, hidden_dim), jnp.float32),
    }


def mixer_block_ref(x, p):
    # Plain-JAX mirror of the PyTorch forward, for the sanity check.
    def ln(v, g, b):
        m = jnp.mean(v, -1, keepdims=True)
        var = jnp.mean(jnp.square(v - m), -1, keepdims=True)
        return (v - m) * jax.lax.rsqrt(var + LN_EPS) * g + b

    out = ln(x, p["g0"][0], p["b0"][0]).transpose(0, 2, 1)            # (B, D, S)
    h = _gelu_exact(out @ p["tw1"].T + p["tb1"][0])                   # (B, D, Tm)
    x = x + (h @ p["tw2"].T + p["tb2"][0]).transpose(0, 2, 1)         # (B, S, D)
    out = ln(x, p["g1"][0], p["b1"][0])
    h = _gelu_exact(out @ p["cw1"] + p["cb1"][0])
    return x + (h @ p["cw2"] + p["cb2"][0])


if __name__ == "__main__":
    # Small but lane-dense shapes: D, Tm, Cm are multiples of 128.
    B, S, D = 4, 8, 128          # batch, num_tokens, hidden_dim
    Tm, Cm = 128, 256            # tokens_mlp_dim, channels_mlp_dim

    key = jax.random.PRNGKey(0)
    kx, kp = jax.random.split(key)
    x = jax.random.normal(kx, (B, S, D), jnp.float32)
    params = init_params(kp, S, D, Tm, Cm)

    ref = mixer_block_ref(x, params)

    # f32 matmul operands: close match to the plain-JAX reference.
    out_f32 = jax.block_until_ready(
        mixer_block(x, params, compute_dtype=jnp.float32))
    assert out_f32.shape == (B, S, D)
    assert jnp.allclose(out_f32, ref, atol=2e-3, rtol=2e-3), \
        float(jnp.max(jnp.abs(out_f32 - ref)))

    # bf16 matmul operands (fast MXU path), f32 accumulation: looser tolerance.
    out_bf16 = jax.block_until_ready(
        mixer_block(x, params, compute_dtype=jnp.bfloat16))
    assert out_bf16.shape == (B, S, D)
    assert jnp.allclose(out_bf16, ref, atol=5e-2, rtol=5e-2), \
        float(jnp.max(jnp.abs(out_bf16 - ref)))

    print("KERNEL_OK")
</pallas_src>

<mosaic_0001>
module attributes {stable_mosaic.version = 11 : i64} {
  func.func @mixer_block_kernel(%arg0: i32, %arg1: memref<2x8x128xf32, #tpu.memory_space<vmem>>, %arg2: memref<1x128xf32, #tpu.memory_space<vmem>>, %arg3: memref<1x128xf32, #tpu.memory_space<vmem>>, %arg4: memref<128x8xf32, #tpu.memory_space<vmem>>, %arg5: memref<1x128xf32, #tpu.memory_space<vmem>>, %arg6: memref<8x128xf32, #tpu.memory_space<vmem>>, %arg7: memref<1x8xf32, #tpu.memory_space<vmem>>, %arg8: memref<1x128xf32, #tpu.memory_space<vmem>>, %arg9: memref<1x128xf32, #tpu.memory_space<vmem>>, %arg10: memref<128x256xf32, #tpu.memory_space<vmem>>, %arg11: memref<1x256xf32, #tpu.memory_space<vmem>>, %arg12: memref<256x128xf32, #tpu.memory_space<vmem>>, %arg13: memref<1x128xf32, #tpu.memory_space<vmem>>, %arg14: memref<2x8x128xf32, #tpu.memory_space<vmem>>) attributes {dimension_semantics = [#tpu.dimension_semantics<parallel>], iteration_bounds = array<i64: 2>, scalar_prefetch = 0 : i64, scratch_operands = 0 : i64, tpu.core_type = #tpu.core_type<tc>, window_params = [{transform_indices = @transform_0, window_bounds = array<i64: 2, 8, 128>}, {pipeline_mode = #tpu.pipeline_mode<synchronous>, transform_indices = @transform_1, window_bounds = array<i64: 1, 128>}, {pipeline_mode = #tpu.pipeline_mode<synchronous>, transform_indices = @transform_2, window_bounds = array<i64: 1, 128>}, {pipeline_mode = #tpu.pipeline_mode<synchronous>, transform_indices = @transform_3, window_bounds = array<i64: 128, 8>}, {pipeline_mode = #tpu.pipeline_mode<synchronous>, transform_indices = @transform_4, window_bounds = array<i64: 1, 128>}, {pipeline_mode = #tpu.pipeline_mode<synchronous>, transform_indices = @transform_5, window_bounds = array<i64: 8, 128>}, {pipeline_mode = #tpu.pipeline_mode<synchronous>, transform_indices = @transform_6, window_bounds = array<i64: 1, 8>}, {pipeline_mode = #tpu.pipeline_mode<synchronous>, transform_indices = @transform_7, window_bounds = array<i64: 1, 128>}, {pipeline_mode = #tpu.pipeline_mode<synchronous>, transform_indices = @transform_8, window_bounds = array<i64: 1, 128>}, {pipeline_mode = #tpu.pipeline_mode<synchronous>, transform_indices = @transform_9, window_bounds = array<i64: 128, 256>}, {pipeline_mode = #tpu.pipeline_mode<synchronous>, transform_indices = @transform_10, window_bounds = array<i64: 1, 256>}, {pipeline_mode = #tpu.pipeline_mode<synchronous>, transform_indices = @transform_11, window_bounds = array<i64: 256, 128>}, {pipeline_mode = #tpu.pipeline_mode<synchronous>, transform_indices = @transform_12, window_bounds = array<i64: 1, 128>}, {transform_indices = @transform_13, window_bounds = array<i64: 2, 8, 128>}]} {
    %c0 = arith.constant 0 : index
    %c0_0 = arith.constant 0 : index
    %c0_1 = arith.constant 0 : index
    %0 = vector.load %arg1[%c0, %c0_0, %c0_1] : memref<2x8x128xf32, #tpu.memory_space<vmem>>, vector<2x8x128xf32>
    %c0_2 = arith.constant 0 : index
    %c0_3 = arith.constant 0 : index
    %1 = vector.load %arg2[%c0_2, %c0_3] : memref<1x128xf32, #tpu.memory_space<vmem>>, vector<1x128xf32>
    %2 = vector.shape_cast %1 : vector<1x128xf32> to vector<128xf32>
    %c0_4 = arith.constant 0 : index
    %c0_5 = arith.constant 0 : index
    %3 = vector.load %arg3[%c0_4, %c0_5] : memref<1x128xf32, #tpu.memory_space<vmem>>, vector<1x128xf32>
    %4 = vector.shape_cast %3 : vector<1x128xf32> to vector<128xf32>
    %cst = arith.constant dense<0.000000e+00> : vector<2x8xf32>
    %5 = vector.multi_reduction <add>, %0, %cst [2] : vector<2x8x128xf32> to vector<2x8xf32>
    %6 = vector.shape_cast %5 : vector<2x8xf32> to vector<2x8x1xf32>
    %cst_6 = arith.constant 1.280000e+02 : f32
    %7 = vector.broadcast %cst_6 : f32 to vector<2x8x1xf32>
    %8 = arith.divf %6, %7 : vector<2x8x1xf32>
    %9 = arith.mulf %0, %0 : vector<2x8x128xf32>
    %cst_7 = arith.constant dense<0.000000e+00> : vector<2x8xf32>
    %10 = vector.multi_reduction <add>, %9, %cst_7 [2] : vector<2x8x128xf32> to vector<2x8xf32>
    %11 = vector.shape_cast %10 : vector<2x8xf32> to vector<2x8x1xf32>
    %cst_8 = arith.constant 1.280000e+02 : f32
    %12 = vector.broadcast %cst_8 : f32 to vector<2x8x1xf32>
    %13 = arith.divf %11, %12 : vector<2x8x1xf32>
    %14 = arith.mulf %8, %8 : vector<2x8x1xf32>
    %15 = arith.subf %13, %14 : vector<2x8x1xf32>
    %cst_9 = arith.constant 9.99999974E-6 : f32
    %16 = vector.broadcast %cst_9 : f32 to vector<2x8x1xf32>
    %17 = arith.addf %15, %16 : vector<2x8x1xf32>
    %18 = math.rsqrt %17 : vector<2x8x1xf32>
    %19 = vector.broadcast %8 : vector<2x8x1xf32> to vector<2x8x128xf32>
    %20 = arith.subf %0, %19 : vector<2x8x128xf32>
    %21 = vector.broadcast %18 : vector<2x8x1xf32> to vector<2x8x128xf32>
    %22 = arith.mulf %20, %21 : vector<2x8x128xf32>
    %23 = vector.shape_cast %2 : vector<128xf32> to vector<1x1x128xf32>
    %24 = vector.broadcast %23 : vector<1x1x128xf32> to vector<2x8x128xf32>
    %25 = arith.mulf %22, %24 : vector<2x8x128xf32>
    %26 = vector.shape_cast %4 : vector<128xf32> to vector<1x1x128xf32>
    %27 = vector.broadcast %26 : vector<1x1x128xf32> to vector<2x8x128xf32>
    %28 = arith.addf %25, %27 : vector<2x8x128xf32>
    %c0_10 = arith.constant 0 : index
    %c0_11 = arith.constant 0 : index
    %29 = vector.load %arg4[%c0_10, %c0_11] : memref<128x8xf32, #tpu.memory_space<vmem>>, vector<128x8xf32>
    %c0_12 = arith.constant 0 : index
    %c0_13 = arith.constant 0 : index
    %30 = vector.load %arg6[%c0_12, %c0_13] : memref<8x128xf32, #tpu.memory_space<vmem>>, vector<8x128xf32>
    %c0_14 = arith.constant 0 : index
    %c0_15 = arith.constant 0 : index
    %31 = vector.load %arg5[%c0_14, %c0_15] : memref<1x128xf32, #tpu.memory_space<vmem>>, vector<1x128xf32>
    %32 = vector.shape_cast %31 : vector<1x128xf32> to vector<128xf32>
    %33 = vector.shape_cast %32 : vector<128xf32> to vector<128x1xf32>
    %c0_16 = arith.constant 0 : index
    %c0_17 = arith.constant 0 : index
    %34 = vector.load %arg7[%c0_16, %c0_17] : memref<1x8xf32, #tpu.memory_space<vmem>>, vector<1x8xf32>
    %35 = vector.shape_cast %34 : vector<1x8xf32> to vector<8xf32>
    %36 = vector.shape_cast %35 : vector<8xf32> to vector<8x1xf32>
    %37 = vector.extract_strided_slice %28 {offsets = [0, 0, 0], sizes = [1, 8, 128], strides = [1, 1, 1]} : vector<2x8x128xf32> to vector<1x8x128xf32>
    %38 = vector.shape_cast %37 : vector<1x8x128xf32> to vector<8x128xf32>
    %cst_18 = arith.constant dense<0.000000e+00> : vector<128x128xf32>
    %39 = tpu.matmul %29, %38, %cst_18 {dimension_numbers = #tpu.dot_dimension_numbers<[1], [0], [0], [1], [0, 0, 1, 1], [], []>} : vector<128x8xf32>, vector<8x128xf32>, vector<128x128xf32> -> vector<128x128xf32>
    %40 = vector.broadcast %33 : vector<128x1xf32> to vector<128x128xf32>
    %41 = arith.addf %39, %40 : vector<128x128xf32>
    %cst_19 = arith.constant 5.000000e-01 : f32
    %42 = vector.broadcast %cst_19 : f32 to vector<128x128xf32>
    %43 = arith.mulf %42, %41 : vector<128x128xf32>
    %cst_20 = arith.constant 0.707106769 : f32
    %44 = vector.broadcast %cst_20 : f32 to vector<128x128xf32>
    %45 = arith.mulf %41, %44 : vector<128x128xf32>
    %46 = math.erf %45 : vector<128x128xf32>
    %cst_21 = arith.constant 1.000000e+00 : f32
    %47 = vector.broadcast %cst_21 : f32 to vector<128x128xf32>
    %48 = arith.addf %47, %46 : vector<128x128xf32>
    %49 = arith.mulf %43, %48 : vector<128x128xf32>
    %cst_22 = arith.constant dense<0.000000e+00> : vector<8x128xf32>
    %50 = tpu.matmul %30, %49, %cst_22 {dimension_numbers = #tpu.dot_dimension_numbers<[1], [0], [0], [1], [0, 0, 1, 1], [], []>} : vector<8x128xf32>, vector<128x128xf32>, vector<8x128xf32> -> vector<8x128xf32>
    %51 = vector.broadcast %36 : vector<8x1xf32> to vector<8x128xf32>
    %52 = arith.addf %50, %51 : vector<8x128xf32>
    %53 = vector.extract_strided_slice %0 {offsets = [0, 0, 0], sizes = [1, 8, 128], strides = [1, 1, 1]} : vector<2x8x128xf32> to vector<1x8x128xf32>
    %54 = vector.shape_cast %53 : vector<1x8x128xf32> to vector<8x128xf32>
    %55 = arith.addf %54, %52 : vector<8x128xf32>
    %56 = vector.extract_strided_slice %28 {offsets = [1, 0, 0], sizes = [1, 8, 128], strides = [1, 1, 1]} : vector<2x8x128xf32> to vector<1x8x128xf32>
    %57 = vector.shape_cast %56 : vector<1x8x128xf32> to vector<8x128xf32>
    %cst_23 = arith.constant dense<0.000000e+00> : vector<128x128xf32>
    %58 = tpu.matmul %29, %57, %cst_23 {dimension_numbers = #tpu.dot_dimension_numbers<[1], [0], [0], [1], [0, 0, 1, 1], [], []>} : vector<128x8xf32>, vector<8x128xf32>, vector<128x128xf32> -> vector<128x128xf32>
    %59 = vector.broadcast %33 : vector<128x1xf32> to vector<128x128xf32>
    %60 = arith.addf %58, %59 : vector<128x128xf32>
    %cst_24 = arith.constant 5.000000e-01 : f32
    %61 = vector.broadcast %cst_24 : f32 to vector<128x128xf32>
    %62 = arith.mulf %61, %60 : vector<128x128xf32>
    %cst_25 = arith.constant 0.707106769 : f32
    %63 = vector.broadcast %cst_25 : f32 to vector<128x128xf32>
    %64 = arith.mulf %60, %63 : vector<128x128xf32>
    %65 = math.erf %64 : vector<128x128xf32>
    %cst_26 = arith.constant 1.000000e+00 : f32
    %66 = vector.broadcast %cst_26 : f32 to vector<128x128xf32>
    %67 = arith.addf %66, %65 : vector<128x128xf32>
    %68 = arith.mulf %62, %67 : vector<128x128xf32>
    %cst_27 = arith.constant dense<0.000000e+00> : vector<8x128xf32>
    %69 = tpu.matmul %30, %68, %cst_27 {dimension_numbers = #tpu.dot_dimension_numbers<[1], [0], [0], [1], [0, 0, 1, 1], [], []>} : vector<8x128xf32>, vector<128x128xf32>, vector<8x128xf32> -> vector<8x128xf32>
    %70 = vector.broadcast %36 : vector<8x1xf32> to vector<8x128xf32>
    %71 = arith.addf %69, %70 : vector<8x128xf32>
    %72 = vector.extract_strided_slice %0 {offsets = [1, 0, 0], sizes = [1, 8, 128], strides = [1, 1, 1]} : vector<2x8x128xf32> to vector<1x8x128xf32>
    %73 = vector.shape_cast %72 : vector<1x8x128xf32> to vector<8x128xf32>
    %74 = arith.addf %73, %71 : vector<8x128xf32>
    %75 = vector.shape_cast %55 : vector<8x128xf32> to vector<1x8x128xf32>
    %76 = vector.shape_cast %74 : vector<8x128xf32> to vector<1x8x128xf32>
    %77 = tpu.concatenate %75, %76 in 0 : vector<1x8x128xf32>, vector<1x8x128xf32> -> vector<2x8x128xf32>
    %c0_28 = arith.constant 0 : index
    %c0_29 = arith.constant 0 : index
    %78 = vector.load %arg8[%c0_28, %c0_29] : memref<1x128xf32, #tpu.memory_space<vmem>>, vector<1x128xf32>
    %79 = vector.shape_cast %78 : vector<1x128xf32> to vector<128xf32>
    %c0_30 = arith.constant 0 : index
    %c0_31 = arith.constant 0 : index
    %80 = vector.load %arg9[%c0_30, %c0_31] : memref<1x128xf32, #tpu.memory_space<vmem>>, vector<1x128xf32>
    %81 = vector.shape_cast %80 : vector<1x128xf32> to vector<128xf32>
    %cst_32 = arith.constant dense<0.000000e+00> : vector<2x8xf32>
    %82 = vector.multi_reduction <add>, %77, %cst_32 [2] : vector<2x8x128xf32> to vector<2x8xf32>
    %83 = vector.shape_cast %82 : vector<2x8xf32> to vector<2x8x1xf32>
    %cst_33 = arith.constant 1.280000e+02 : f32
    %84 = vector.broadcast %cst_33 : f32 to vector<2x8x1xf32>
    %85 = arith.divf %83, %84 : vector<2x8x1xf32>
    %86 = arith.mulf %77, %77 : vector<2x8x128xf32>
    %cst_34 = arith.constant dense<0.000000e+00> : vector<2x8xf32>
    %87 = vector.multi_reduction <add>, %86, %cst_34 [2] : vector<2x8x128xf32> to vector<2x8xf32>
    %88 = vector.shape_cast %87 : vector<2x8xf32> to vector<2x8x1xf32>
    %cst_35 = arith.constant 1.280000e+02 : f32
    %89 = vector.broadcast %cst_35 : f32 to vector<2x8x1xf32>
    %90 = arith.divf %88, %89 : vector<2x8x1xf32>
    %91 = arith.mulf %85, %85 : vector<2x8x1xf32>
    %92 = arith.subf %90, %91 : vector<2x8x1xf32>
    %cst_36 = arith.constant 9.99999974E-6 : f32
    %93 = vector.broadcast %cst_36 : f32 to vector<2x8x1xf32>
    %94 = arith.addf %92, %93 : vector<2x8x1xf32>
    %95 = math.rsqrt %94 : vector<2x8x1xf32>
    %96 = vector.broadcast %85 : vector<2x8x1xf32> to vector<2x8x128xf32>
    %97 = arith.subf %77, %96 : vector<2x8x128xf32>
    %98 = vector.broadcast %95 : vector<2x8x1xf32> to vector<2x8x128xf32>
    %99 = arith.mulf %97, %98 : vector<2x8x128xf32>
    %100 = vector.shape_cast %79 : vector<128xf32> to vector<1x1x128xf32>
    %101 = vector.broadcast %100 : vector<1x1x128xf32> to vector<2x8x128xf32>
    %102 = arith.mulf %99, %101 : vector<2x8x128xf32>
    %103 = vector.shape_cast %81 : vector<128xf32> to vector<1x1x128xf32>
    %104 = vector.broadcast %103 : vector<1x1x128xf32> to vector<2x8x128xf32>
    %105 = arith.addf %102, %104 : vector<2x8x128xf32>
    %106 = vector.shape_cast %105 : vector<2x8x128xf32> to vector<16x128xf32>
    %c0_37 = arith.constant 0 : index
    %c0_38 = arith.constant 0 : index
    %107 = vector.load %arg10[%c0_37, %c0_38] : memref<128x256xf32, #tpu.memory_space<vmem>>, vector<128x256xf32>
    %c0_39 = arith.constant 0 : index
    %c0_40 = arith.constant 0 : index
    %108 = vector.load %arg12[%c0_39, %c0_40] : memref<256x128xf32, #tpu.memory_space<vmem>>, vector<256x128xf32>
    %cst_41 = arith.constant dense<0.000000e+00> : vector<16x256xf32>
    %109 = tpu.matmul %106, %107, %cst_41 {dimension_numbers = #tpu.dot_dimension_numbers<[1], [0], [0], [1], [0, 0, 1, 1], [], []>} : vector<16x128xf32>, vector<128x256xf32>, vector<16x256xf32> -> vector<16x256xf32>
    %c0_42 = arith.constant 0 : index
    %c0_43 = arith.constant 0 : index
    %110 = vector.load %arg11[%c0_42, %c0_43] : memref<1x256xf32, #tpu.memory_space<vmem>>, vector<1x256xf32>
    %111 = vector.shape_cast %110 : vector<1x256xf32> to vector<256xf32>
    %112 = vector.shape_cast %111 : vector<256xf32> to vector<1x256xf32>
    %113 = vector.broadcast %112 : vector<1x256xf32> to vector<16x256xf32>
    %114 = arith.addf %109, %113 : vector<16x256xf32>
    %cst_44 = arith.constant 5.000000e-01 : f32
    %115 = vector.broadcast %cst_44 : f32 to vector<16x256xf32>
    %116 = arith.mulf %115, %114 : vector<16x256xf32>
    %cst_45 = arith.constant 0.707106769 : f32
    %117 = vector.broadcast %cst_45 : f32 to vector<16x256xf32>
    %118 = arith.mulf %114, %117 : vector<16x256xf32>
    %119 = math.erf %118 : vector<16x256xf32>
    %cst_46 = arith.constant 1.000000e+00 : f32
    %120 = vector.broadcast %cst_46 : f32 to vector<16x256xf32>
    %121 = arith.addf %120, %119 : vector<16x256xf32>
    %122 = arith.mulf %116, %121 : vector<16x256xf32>
    %cst_47 = arith.constant dense<0.000000e+00> : vector<16x128xf32>
    %123 = tpu.matmul %122, %108, %cst_47 {dimension_numbers = #tpu.dot_dimension_numbers<[1], [0], [0], [1], [0, 0, 1, 1], [], []>} : vector<16x256xf32>, vector<256x128xf32>, vector<16x128xf32> -> vector<16x128xf32>
    %c0_48 = arith.constant 0 : index
    %c0_49 = arith.constant 0 : index
    %124 = vector.load %arg13[%c0_48, %c0_49] : memref<1x128xf32, #tpu.memory_space<vmem>>, vector<1x128xf32>
    %125 = vector.shape_cast %124 : vector<1x128xf32> to vector<128xf32>
    %126 = vector.shape_cast %125 : vector<128xf32> to vector<1x128xf32>
    %127 = vector.broadcast %126 : vector<1x128xf32> to vector<16x128xf32>
    %128 = arith.addf %123, %127 : vector<16x128xf32>
    %129 = vector.shape_cast %128 : vector<16x128xf32> to vector<2x8x128xf32>
    %130 = arith.addf %77, %129 : vector<2x8x128xf32>
    %c0_50 = arith.constant 0 : index
    %c0_51 = arith.constant 0 : index
    %c0_52 = arith.constant 0 : index
    %131 = vector.load %arg14[%c0_50, %c0_51, %c0_52] : memref<2x8x128xf32, #tpu.memory_space<vmem>>, vector<2x8x128xf32>
    tpu.vector_store %arg14[%c0_50, %c0_51, %c0_52], %130 {strides = array<i32>} : memref<2x8x128xf32, #tpu.memory_space<vmem>>, vector<2x8x128xf32>,
    return
  }
  func.func @transform_0(%arg0: i32) -> (i32, i32, i32) {
    %c0_i32 = arith.constant 0 : i32
    %c0_i32_0 = arith.constant 0 : i32
    %c0_i32_1 = arith.constant 0 : i32
    return %arg0, %c0_i32, %c0_i32_0 : i32, i32, i32
  }
  func.func @transform_1(%arg0: i32) -> (i32, i32) {
    %c0_i32 = arith.constant 0 : i32
    %c0_i32_0 = arith.constant 0 : i32
    %c0_i32_1 = arith.constant 0 : i32
    return %c0_i32, %c0_i32_0 : i32, i32
  }
  func.func @transform_2(%arg0: i32) -> (i32, i32) {
    %c0_i32 = arith.constant 0 : i32
    %c0_i32_0 = arith.constant 0 : i32
    %c0_i32_1 = arith.constant 0 : i32
    return %c0_i32, %c0_i32_0 : i32, i32
  }
  func.func @transform_3(%arg0: i32) -> (i32, i32) {
    %c0_i32 = arith.constant 0 : i32
    %c0_i32_0 = arith.constant 0 : i32
    %c0_i32_1 = arith.constant 0 : i32
    return %c0_i32, %c0_i32_0 : i32, i32
  }
  func.func @transform_4(%arg0: i32) -> (i32, i32) {
    %c0_i32 = arith.constant 0 : i32
    %c0_i32_0 = arith.constant 0 : i32
    %c0_i32_1 = arith.constant 0 : i32
    return %c0_i32, %c0_i32_0 : i32, i32
  }
  func.func @transform_5(%arg0: i32) -> (i32, i32) {
    %c0_i32 = arith.constant 0 : i32
    %c0_i32_0 = arith.constant 0 : i32
    %c0_i32_1 = arith.constant 0 : i32
    return %c0_i32, %c0_i32_0 : i32, i32
  }
  func.func @transform_6(%arg0: i32) -> (i32, i32) {
    %c0_i32 = arith.constant 0 : i32
    %c0_i32_0 = arith.constant 0 : i32
    %c0_i32_1 = arith.constant 0 : i32
    return %c0_i32, %c0_i32_0 : i32, i32
  }
  func.func @transform_7(%arg0: i32) -> (i32, i32) {
    %c0_i32 = arith.constant 0 : i32
    %c0_i32_0 = arith.constant 0 : i32
    %c0_i32_1 = arith.constant 0 : i32
    return %c0_i32, %c0_i32_0 : i32, i32
  }
  func.func @transform_8(%arg0: i32) -> (i32, i32) {
    %c0_i32 = arith.constant 0 : i32
    %c0_i32_0 = arith.constant 0 : i32
    %c0_i32_1 = arith.constant 0 : i32
    return %c0_i32, %c0_i32_0 : i32, i32
  }
  func.func @transform_9(%arg0: i32) -> (i32, i32) {
    %c0_i32 = arith.constant 0 : i32
    %c0_i32_0 = arith.constant 0 : i32
    %c0_i32_1 = arith.constant 0 : i32
    return %c0_i32, %c0_i32_0 : i32, i32
  }
  func.func @transform_10(%arg0: i32) -> (i32, i32) {
    %c0_i32 = arith.constant 0 : i32
    %c0_i32_0 = arith.constant 0 : i32
    %c0_i32_1 = arith.constant 0 : i32
    return %c0_i32, %c0_i32_0 : i32, i32
  }
  func.func @transform_11(%arg0: i32) -> (i32, i32) {
    %c0_i32 = arith.constant 0 : i32
    %c0_i32_0 = arith.constant 0 : i32
    %c0_i32_1 = arith.constant 0 : i32
    return %c0_i32, %c0_i32_0 : i32, i32
  }
  func.func @transform_12(%arg0: i32) -> (i32, i32) {
    %c0_i32 = arith.constant 0 : i32
    %c0_i32_0 = arith.constant 0 : i32
    %c0_i32_1 = arith.constant 0 : i32
    return %c0_i32, %c0_i32_0 : i32, i32
  }
  func.func @transform_13(%arg0: i32) -> (i32, i32, i32) {
    %c0_i32 = arith.constant 0 : i32
    %c0_i32_0 = arith.constant 0 : i32
    %c0_i32_1 = arith.constant 0 : i32
    return %arg0, %c0_i32, %c0_i32_0 : i32, i32, i32
  }
}

</mosaic_0001>

<bundles_post_ra>
// kernel: _mixer_block_call.1
= control target key start
LH: loop header
LB: loop body
LE: loop exit
PB: predicated region body
PF: predicated region fallthrough
CT: control target
= control target key end

     0   :  { %s3814_s0 = inlined_call_operand.hbm [shape: f32[4,8,128], index: 0, kind: input, shape index: {}]   ;;  %s3815_s1 = inlined_call_operand.hbm [shape: f32[1,128], index: 1, kind: input, shape index: {}]   ;;  %s3816_s2 = inlined_call_operand.hbm [shape: f32[1,128], index: 2, kind: input, shape index: {}]   ;;  %s3817_s3 = inlined_call_operand.hbm [shape: f32[128,8], index: 3, kind: input, shape index: {}]   ;;  %s3818_s4 = inlined_call_operand.hbm [shape: f32[1,128], index: 4, kind: input, shape index: {}]   ;;  %s3819_s5 = inlined_call_operand.hbm [shape: f32[8,128], index: 5, kind: input, shape index: {}]   ;;  %s3820_s6 = inlined_call_operand.hbm [shape: f32[1,8], index: 6, kind: input, shape index: {}]   ;;  %s3821_s7 = inlined_call_operand.hbm [shape: f32[1,128], index: 7, kind: input, shape index: {}]   ;;  %s3822_s8 = inlined_call_operand.hbm [shape: f32[1,128], index: 8, kind: input, shape index: {}]   ;;  %s3823_s9 = inlined_call_operand.hbm [shape: f32[128,256], index: 9, kind: input, shape index: {}]   ;;  %s3824_s10 = inlined_call_operand.hbm [shape: f32[1,256], index: 10, kind: input, shape index: {}]   ;;  %s3825_s11 = inlined_call_operand.hbm [shape: f32[256,128], index: 11, kind: input, shape index: {}]   ;;  %s3826_s12 = inlined_call_operand.hbm [shape: f32[1,128], index: 12, kind: input, shape index: {}]   ;;  %s3827_s13 = inlined_call_operand.hbm [shape: f32[4,8,128], index: 13, kind: output, shape index: {}]  }
   0x1   :  { %3838 = sst [smem:[#allocation33_spill]] %s3814_s0 }
   0x2   :  { %3839 = sst [smem:[#allocation34_spill]] %s3815_s1 }
   0x3   :  { %3840 = sst [smem:[#allocation35_spill]] %s3816_s2 }
   0x4   :  { %3841 = sst [smem:[#allocation36_spill]] %s3817_s3 }
   0x5   :  { %3842 = sst [smem:[#allocation37_spill]] %s3819_s5 }
   0x6   :  { %3843 = sst [smem:[#allocation38_spill]] %s3821_s7 }
   0x7   :  { %3844 = sst [smem:[#allocation39_spill]] %s3827_s13 }
   0x8   :  { %18 = vsyncpa [#allocation3], 0 }
   0x9   :  { %20 = vsyncpa [#allocation3 + $0x1], 0 }
   0xa   :  { %21 = vsyncpa [#allocation6], 0 }
   0xb   :  { %22 = vsyncpa [#allocation9], 0 }
   0xc   :  { %23 = vsyncpa [#allocation12], 0 }
   0xd   :  { %24 = vsyncpa [#allocation15], 0 }
   0xe   :  { %25 = vsyncpa [#allocation18], 0 }
   0xf   :  { %26 = vsyncpa [#allocation21], 0 }
  0x10   :  { %27 = vsyncpa [#allocation4], 0 }
  0x11   :  { %29 = vsyncpa [#allocation4 + $0x1], 0  ;;  %s3128_s25 = smov 0   ;;  %s3130_s26 = smov 0  }
  0x12   :  { %s3132_s27 = smov 0   ;;  %s3134_s28 = smov 0  }
  0x13 LB: > { %s3035_s29 = smov [#allocation5]   ;;  %s3149_s14 = sadd.s32 4294967295, %s3033_s28   ;;  %s3033_s28 = sphi %s3134_s28, %s3884_s28   ;;  %s3029_s27 = sphi %s3132_s27, %s3883_s27   ;;  %s3025_s26 = sphi %s3130_s26, %s3882_s26   ;;  %s3021_s25 = sphi %s3128_s25, %s3881_s25  }
  0x14   : > { %s357_s30 = sshll.u32 %s3035_s29, 4  ;;  %p1903_p0 = scmp.ge.s32.totalorder %s3033_s28, 1  ;;  %s3154_s30 = int_to_ptr.vmem [resolvable:$true] %s357_s30 }
  0x15   : > { %p3835_p1 = scmp.eq.s32.totalorder %s3149_s14, 0  ;;  %p344_p2 = scmp.lt.s32.totalorder %s3033_s28, 3 }
  0x16   : > { %s3036_s16 = smov [#allocation8]   ;;  %s3037_s19 = smov [#allocation11]  }
  0x17   : > { %p3156_p3 = pnand %p1903_p0, %p344_p2  ;;  %s378_s17 = sshll.u32 %s3036_s16, 4  ;;  %s3163_s17 = int_to_ptr.vmem [resolvable:$true] %s378_s17 }
  0x18   : > { %s403_s20 = sshll.u32 %s3037_s19, 4  ;;  %s3848_s1 = sld [smem:[#allocation34_spill]]  ;;  %s3171_s20 = int_to_ptr.vmem [resolvable:$true] %s403_s20 }
  0x19   : > { %s3845_s15 = scalar_select %p3156_p3, 1, 0 }
  0x1a   : > { %p2373_p5 = pneg %p3156_p3 }
  0x1b   : > { %3846 = sst [smem:[#allocation32_spill]] %s3845_s15 }
  0x1c   : > { %p3167_p6 = pnand %p2373_p5, %p3835_p1 }
  0x1e   : > { %s2577_s23 = scalar_lea.hbm %s3848_s1, 16  ;;  %p3181_p8 = pneg %p3167_p6 }
  0x1f   : > { %p2578_p7 = scmp.ne.s32.totalorder %s3848_s1, %s2577_s23  ;;  %p2584_p11 = scmp.lt.u32.totalorder %s2577_s23, %s3848_s1 }
  0x21   : > { %p2580_p9 = pnand %p3181_p8, %p2578_p7 }
  0x23   : > { %p2581_p10 = pneg %p2580_p9 }
  0x25   : > { %p2586_p12 = pnand %p2584_p11, %p2581_p10 }
  0x27   : > { %2589 = shalt.err (!%p2586_p12)
}
  0x28   : > { %s2590_s21 = scalar_lea.vmem %s3154_s30, 16  ;;  %s2597_s22 = scalar_lea.vmem %s3154_s30, 32 }
  0x29   : > { %p2591_p13 = scmp.ne.s32.totalorder %s3154_s30, %s2590_s21  ;;  %p2598_p5 = scmp.lt.s32.totalorder %s3154_s30, %s3154_s30 }
  0x2a   : > { %p2599_p7 = scmp.lt.s32.totalorder %s2597_s22, %s2590_s21 }
  0x2b   : > { %p2593_p0 = pnand %p2591_p13, %p3181_p8 }
  0x2c   : > { %p2600_p9 = por %p2599_p7, %p2598_p5 }
  0x2d   : > { %p2594_p2 = pneg %p2593_p0 }
  0x2f   : > { %p2601_p4 = pnand %p2600_p9, %p2594_p2 }
  0x31   : > { %2604 = shalt.err (!%p2601_p4)
}
  0x32   : > { %2376 = dma.hbm_to_vmem [thread:$0]  (!%p3167_p6), %s3848_s1, 16, %s3154_s30, [#allocation6]  }
  0x33   : > { %s3850_s3 = sld [smem:[#allocation36_spill]] }
  0x39   : > { %s2605_s19 = scalar_lea.hbm %s3850_s3, 2048 }
  0x3a   : > { %p2606_p10 = scmp.ne.s32.totalorder %s3850_s3, %s2605_s19  ;;  %p2612_p4 = scmp.lt.u32.totalorder %s2605_s19, %s3850_s3 }
  0x3c   : > { %p2608_p11 = pnand %p2606_p10, %p3181_p8 }
  0x3e   : > { %p2609_p12 = pneg %p2608_p11 }
  0x40   : > { %p2614_p13 = pnand %p2612_p4, %p2609_p12 }
  0x42   : > { %2617 = shalt.err (!%p2614_p13)
}
  0x43   : > { %s2618_s30 = scalar_lea.vmem %s3163_s17, 2048  ;;  %p2626_p7 = scmp.lt.s32.totalorder %s3163_s17, %s3163_s17 }
  0x44   : > { %p2619_p0 = scmp.ne.s32.totalorder %s3163_s17, %s2618_s30  ;;  %p2627_p9 = scmp.lt.s32.totalorder %s2618_s30, %s2618_s30 }
  0x46   : > { %p2621_p2 = pnand %p2619_p0, %p3181_p8  ;;  %p2628_p10 = por %p2627_p9, %p2626_p7 }
  0x48   : > { %p2622_p5 = pneg %p2621_p2 }
  0x4a   : > { %p2629_p11 = pnand %p2628_p10, %p2622_p5 }
  0x4c   : > { %2632 = shalt.err (!%p2629_p11)
}
  0x4d   : > { %s3831_s0 = smov 128   ;;  %s3833_s15 = smov 8  }
  0x4e   : > { %2382 = dma.hbm_to_vmem [thread:$0]  (!%p3167_p6), %s3850_s3, 2048, %s3163_s17, [#allocation9], %s3831_s0, %s3831_s0, %s3833_s15  }
  0x4f   : > { %s3851_s5 = sld [smem:[#allocation37_spill]] }
  0x55   : > { %s2633_s19 = scalar_lea.hbm %s3851_s5, 128 }
  0x56   : > { %p2634_p12 = scmp.ne.s32.totalorder %s3851_s5, %s2633_s19  ;;  %p2640_p0 = scmp.lt.u32.totalorder %s2633_s19, %s3851_s5 }
  0x58   : > { %p2636_p4 = pnand %p2634_p12, %p3181_p8 }
  0x5a   : > { %p2637_p13 = pneg %p2636_p4 }
  0x5c   : > { %p2642_p2 = pnand %p2640_p0, %p2637_p13 }
  0x5e   : > { %2645 = shalt.err (!%p2642_p2)
}
  0x5f   : > { %s2646_s17 = scalar_lea.vmem %s3171_s20, 128  ;;  %p2654_p10 = scmp.lt.s32.totalorder %s3171_s20, %s3171_s20 }
  0x60   : > { %p2647_p5 = scmp.ne.s32.totalorder %s3171_s20, %s2646_s17  ;;  %p2655_p11 = scmp.lt.s32.totalorder %s2646_s17, %s2646_s17 }
  0x62   : > { %p2649_p7 = pnand %p2647_p5, %p3181_p8  ;;  %p2656_p12 = por %p2655_p11, %p2654_p10 }
  0x64   : > { %p2650_p9 = pneg %p2649_p7 }
  0x66   : > { %p2657_p4 = pnand %p2656_p12, %p2650_p9 }
  0x68   : > { %2660 = shalt.err (!%p2657_p4)
}
  0x69   : > { %2388 = dma.hbm_to_vmem [thread:$0]  (!%p3167_p6), %s3851_s5, 128, %s3171_s20, [#allocation12]  }
  0x6a   : > { %s3040_s23 = smov [#allocation14]   ;;  %s3041_s29 = smov [#allocation17]  }
  0x6b   : > { %s425_s24 = sshll.u32 %s3040_s23, 4  ;;  %s446_s19 = sshll.u32 %s3041_s29, 4  ;;  %s426_s24 = int_to_ptr.vmem [resolvable:$true] %s425_s24  ;;  %s447_s19 = int_to_ptr.vmem [resolvable:$true] %s446_s19 }
  0x6c   : > { %s3852_s7 = sld [smem:[#allocation38_spill]] }
  0x72   : > { %s2661_s30 = scalar_lea.hbm %s3852_s7, 16 }
  0x73   : > { %p2662_p13 = scmp.ne.s32.totalorder %s3852_s7, %s2661_s30  ;;  %p2668_p5 = scmp.lt.u32.totalorder %s2661_s30, %s3852_s7 }
  0x75   : > { %p2664_p0 = pnand %p2662_p13, %p3181_p8 }
  0x77   : > { %p2665_p2 = pneg %p2664_p0 }
  0x79   : > { %p2670_p7 = pnand %p2668_p5, %p2665_p2 }
  0x7b   : > { %2673 = shalt.err (!%p2670_p7)
}
  0x7c   : > { %s2674_s20 = scalar_lea.vmem %s426_s24, 16  ;;  %s2681_s13 = scalar_lea.vmem %s426_s24, 32 }
  0x7d   : > { %p2675_p9 = scmp.ne.s32.totalorder %s426_s24, %s2674_s20  ;;  %p2682_p12 = scmp.lt.s32.totalorder %s426_s24, %s426_s24 }
  0x7e   : > { %p2683_p4 = scmp.lt.s32.totalorder %s2681_s13, %s2674_s20 }
  0x7f   : > { %p2677_p10 = pnand %p2675_p9, %p3181_p8 }
  0x80   : > { %p2684_p1 = por %p2683_p4, %p2682_p12 }
  0x81   : > { %p2678_p11 = pneg %p2677_p10 }
  0x83   : > { %p2685_p3 = pnand %p2684_p1, %p2678_p11 }
  0x85   : > { %2688 = shalt.err (!%p2685_p3)
}
  0x86   : > { %2394 = dma.hbm_to_vmem [thread:$0]  (!%p3167_p6), %s3852_s7, 16, %s426_s24, [#allocation15]  }
  0x87   : > { %s2689_s21 = scalar_lea.hbm %s3823_s9, 4096 }
  0x88   : > { %p2690_p13 = scmp.ne.s32.totalorder %s3823_s9, %s2689_s21  ;;  %p2696_p3 = scmp.lt.u32.totalorder %s2689_s21, %s3823_s9 }
  0x8a   : > { %p2692_p0 = pnand %p2690_p13, %p3181_p8 }
  0x8c   : > { %p2693_p1 = pneg %p2692_p0 }
  0x8e   : > { %p2698_p2 = pnand %p2696_p3, %p2693_p1 }
  0x90   : > { %2701 = shalt.err (!%p2698_p2)
}
  0x91   : > { %s2702_s20 = scalar_lea.vmem %s447_s19, 4096  ;;  %p2710_p10 = scmp.lt.s32.totalorder %s447_s19, %s447_s19 }
  0x92   : > { %p2703_p5 = scmp.ne.s32.totalorder %s447_s19, %s2702_s20  ;;  %p2711_p11 = scmp.lt.s32.totalorder %s2702_s20, %s2702_s20 }
  0x94   : > { %p2705_p7 = pnand %p2703_p5, %p3181_p8  ;;  %p2712_p12 = por %p2711_p11, %p2710_p10 }
  0x96   : > { %p2706_p9 = pneg %p2705_p7 }
  0x98   : > { %p2713_p4 = pnand %p2712_p12, %p2706_p9 }
  0x9a   : > { %2716 = shalt.err (!%p2713_p4)
}
  0x9b   : > { %s3042_s24 = smov 256   ;;  %s3043_s13 = smov 16  }
  0x9c   : > { %2400 = dma.hbm_to_vmem [thread:$0]  (!%p3167_p6), %s3823_s9, 4096, %s447_s19, [#allocation18], %s3042_s24, %s3042_s24, %s3043_s13  }
  0x9d   : > { %s3044_s15 = smov [#allocation20]   ;;  %s3045_s21 = smov [#allocation7]  }
  0x9e   : > { %s470_s29 = sshll.u32 %s3044_s15, 4  ;;  %s368_s22 = sshll.u32 %s3045_s21, 4  ;;  %s471_s29 = int_to_ptr.vmem [resolvable:$true] %s470_s29  ;;  %s369_s22 = int_to_ptr.vmem [resolvable:$true] %s368_s22 }
  0x9f   : > { %s2717_s1 = scalar_lea.hbm %s3825_s11, 4096 }
  0xa0   : > { %p2718_p13 = scmp.ne.s32.totalorder %s3825_s11, %s2717_s1  ;;  %p2724_p3 = scmp.lt.u32.totalorder %s2717_s1, %s3825_s11 }
  0xa2   : > { %p2720_p0 = pnand %p2718_p13, %p3181_p8 }
  0xa4   : > { %p2721_p1 = pneg %p2720_p0 }
  0xa6   : > { %p2726_p2 = pnand %p2724_p3, %p2721_p1 }
  0xa8   : > { %2729 = shalt.err (!%p2726_p2)
}
  0xa9   : > { %s2730_s19 = scalar_lea.vmem %s471_s29, 4096  ;;  %p2738_p10 = scmp.lt.s32.totalorder %s471_s29, %s471_s29 }
  0xaa   : > { %p2731_p5 = scmp.ne.s32.totalorder %s471_s29, %s2730_s19  ;;  %p2739_p11 = scmp.lt.s32.totalorder %s2730_s19, %s2730_s19 }
  0xac   : > { %p2733_p7 = pnand %p2731_p5, %p3181_p8  ;;  %p2740_p12 = por %p2739_p11, %p2738_p10 }
  0xae   : > { %p2734_p9 = pneg %p2733_p7 }
  0xb0   : > { %p2741_p4 = pnand %p2740_p12, %p2734_p9 }
  0xb2   : > { %2744 = shalt.err (!%p2741_p4)
}
  0xb3   : > { %s3853_s3 = smov 8   ;;  %s3854_s24 = smov 128  }
  0xb4   : > { %2406 = dma.hbm_to_vmem [thread:$0]  (!%p3167_p6), %s3825_s11, 4096, %s471_s29, [#allocation21], %s3854_s24, %s3854_s24, %s3853_s3  }
  0xb5   : > { %s3855_s2 = sld [smem:[#allocation35_spill]] }
  0xbb   : > { %s2745_s23 = scalar_lea.hbm %s3855_s2, 16 }
  0xbc   : > { %p2746_p13 = scmp.ne.s32.totalorder %s3855_s2, %s2745_s23  ;;  %p2752_p3 = scmp.lt.u32.totalorder %s2745_s23, %s3855_s2 }
  0xbe   : > { %p2748_p0 = pnand %p2746_p13, %p3181_p8 }
  0xc0   : > { %p2749_p1 = pneg %p2748_p0 }
  0xc2   : > { %p2754_p2 = pnand %p2752_p3, %p2749_p1 }
  0xc4   : > { %2757 = shalt.err (!%p2754_p2)
}
  0xc5   : > { %s2758_s1 = scalar_lea.vmem %s369_s22, 16  ;;  %s2765_s29 = scalar_lea.vmem %s369_s22, 32 }
  0xc6   : > { %p2759_p5 = scmp.ne.s32.totalorder %s369_s22, %s2758_s1  ;;  %p2766_p10 = scmp.lt.s32.totalorder %s369_s22, %s369_s22 }
  0xc7   : > { %p2767_p11 = scmp.lt.s32.totalorder %s2765_s29, %s2758_s1 }
  0xc8   : > { %p2761_p7 = pnand %p2759_p5, %p3181_p8 }
  0xc9   : > { %p2768_p12 = por %p2767_p11, %p2766_p10 }
  0xca   : > { %p2762_p9 = pneg %p2761_p7 }
  0xcc   : > { %p2769_p4 = pnand %p2768_p12, %p2762_p9 }
  0xce   : > { %2772 = shalt.err (!%p2769_p4)
}
  0xcf   : > { %2379 = dma.hbm_to_vmem [thread:$0]  (!%p3167_p6), %s3855_s2, 16, %s369_s22, [#allocation6]  }
  0xd0   : > { %s3046_s5 = smov [#allocation10]   ;;  %s3047_s13 = smov [#allocation13]  }
  0xd1   : > { %s392_s7 = sshll.u32 %s3046_s5, 4  ;;  %s414_s0 = sshll.u32 %s3047_s13, 4  ;;  %s393_s7 = int_to_ptr.vmem [resolvable:$true] %s392_s7  ;;  %s415_s0 = int_to_ptr.vmem [resolvable:$true] %s414_s0 }
  0xd2   : > { %s2773_s21 = scalar_lea.hbm %s3818_s4, 16 }
  0xd3   : > { %p2774_p13 = scmp.ne.s32.totalorder %s3818_s4, %s2773_s21  ;;  %p2780_p3 = scmp.lt.u32.totalorder %s2773_s21, %s3818_s4 }
  0xd5   : > { %p2776_p0 = pnand %p2774_p13, %p3181_p8 }
  0xd7   : > { %p2777_p1 = pneg %p2776_p0 }
  0xd9   : > { %p2782_p2 = pnand %p2780_p3, %p2777_p1 }
  0xdb   : > { %2785 = shalt.err (!%p2782_p2)
}
  0xdc   : > { %s2786_s22 = scalar_lea.vmem %s393_s7, 16  ;;  %s2793_s20 = scalar_lea.vmem %s393_s7, 32 }
  0xdd   : > { %p2787_p5 = scmp.ne.s32.totalorder %s393_s7, %s2786_s22  ;;  %p2794_p10 = scmp.lt.s32.totalorder %s393_s7, %s393_s7 }
  0xde   : > { %p2795_p11 = scmp.lt.s32.totalorder %s2793_s20, %s2786_s22 }
  0xdf   : > { %p2789_p7 = pnand %p2787_p5, %p3181_p8 }
  0xe0   : > { %p2796_p12 = por %p2795_p11, %p2794_p10 }
  0xe1   : > { %p2790_p9 = pneg %p2789_p7 }
  0xe3   : > { %p2797_p4 = pnand %p2796_p12, %p2790_p9 }
  0xe5   : > { %2800 = shalt.err (!%p2797_p4)
}
  0xe6   : > { %2385 = dma.hbm_to_vmem [thread:$0]  (!%p3167_p6), %s3818_s4, 16, %s393_s7, [#allocation9]  }
  0xe7   : > { %s2801_s15 = scalar_lea.hbm %s3820_s6, 16 }
  0xe8   : > { %p2802_p13 = scmp.ne.s32.totalorder %s3820_s6, %s2801_s15  ;;  %p2808_p3 = scmp.lt.u32.totalorder %s2801_s15, %s3820_s6 }
  0xea   : > { %p2804_p0 = pnand %p2802_p13, %p3181_p8 }
  0xec   : > { %p2805_p1 = pneg %p2804_p0 }
  0xee   : > { %p2810_p2 = pnand %p2808_p3, %p2805_p1 }
  0xf0   : > { %2813 = shalt.err (!%p2810_p2)
}
  0xf1   : > { %s2814_s29 = scalar_lea.vmem %s415_s0, 16  ;;  %s2821_s7 = scalar_lea.vmem %s415_s0, 32 }
  0xf2   : > { %p2815_p5 = scmp.ne.s32.totalorder %s415_s0, %s2814_s29  ;;  %p2822_p10 = scmp.lt.s32.totalorder %s415_s0, %s415_s0 }
  0xf3   : > { %p2823_p11 = scmp.lt.s32.totalorder %s2821_s7, %s2814_s29 }
  0xf4   : > { %p2817_p7 = pnand %p2815_p5, %p3181_p8 }
  0xf5   : > { %p2824_p12 = por %p2823_p11, %p2822_p10 }
  0xf6   : > { %p2818_p9 = pneg %p2817_p7 }
  0xf8   : > { %p2825_p4 = pnand %p2824_p12, %p2818_p9 }
  0xfa   : > { %2828 = shalt.err (!%p2825_p4)
}
  0xfb   : > { %2391 = dma.hbm_to_vmem [thread:$0]  (!%p3167_p6), %s3820_s6, 16, %s415_s0, [#allocation12]  }
  0xfc   : > { %s3048_s19 = smov [#allocation16]   ;;  %s3049_s13 = smov [#allocation19]  }
  0xfd   : > { %s436_s5 = sshll.u32 %s3048_s19, 4  ;;  %s460_s23 = sshll.u32 %s3049_s13, 4  ;;  %s437_s5 = int_to_ptr.vmem [resolvable:$true] %s436_s5  ;;  %s461_s23 = int_to_ptr.vmem [resolvable:$true] %s460_s23 }
  0xfe   : > { %s2829_s30 = scalar_lea.hbm %s3822_s8, 16 }
  0xff   : > { %p2830_p13 = scmp.ne.s32.totalorder %s3822_s8, %s2829_s30  ;;  %p2836_p3 = scmp.lt.u32.totalorder %s2829_s30, %s3822_s8 }
 0x101   : > { %p2832_p0 = pnand %p2830_p13, %p3181_p8 }
 0x103   : > { %p2833_p1 = pneg %p2832_p0 }
 0x105   : > { %p2838_p2 = pnand %p2836_p3, %p2833_p1 }
 0x107   : > { %2841 = shalt.err (!%p2838_p2)
}
 0x108   : > { %s2842_s0 = scalar_lea.vmem %s437_s5, 16  ;;  %s2849_s22 = scalar_lea.vmem %s437_s5, 32 }
 0x109   : > { %p2843_p5 = scmp.ne.s32.totalorder %s437_s5, %s2842_s0  ;;  %p2850_p10 = scmp.lt.s32.totalorder %s437_s5, %s437_s5 }
 0x10a   : > { %p2851_p11 = scmp.lt.s32.totalorder %s2849_s22, %s2842_s0 }
 0x10b   : > { %p2845_p7 = pnand %p2843_p5, %p3181_p8 }
 0x10c   : > { %p2852_p12 = por %p2851_p11, %p2850_p10 }
 0x10d   : > { %p2846_p9 = pneg %p2845_p7 }
 0x10f   : > { %p2853_p4 = pnand %p2852_p12, %p2846_p9 }
 0x111   : > { %2856 = shalt.err (!%p2853_p4)
}
 0x112   : > { %2397 = dma.hbm_to_vmem [thread:$0]  (!%p3167_p6), %s3822_s8, 16, %s437_s5, [#allocation15]  }
 0x113   : > { %s2857_s21 = scalar_lea.hbm %s3824_s10, 32 }
 0x114   : > { %p2858_p13 = scmp.ne.s32.totalorder %s3824_s10, %s2857_s21  ;;  %p2864_p3 = scmp.lt.u32.totalorder %s2857_s21, %s3824_s10 }
 0x116   : > { %p2860_p0 = pnand %p2858_p13, %p3181_p8 }
 0x118   : > { %p2861_p1 = pneg %p2860_p0 }
 0x11a   : > { %p2866_p2 = pnand %p2864_p3, %p2861_p1 }
 0x11c   : > { %2869 = shalt.err (!%p2866_p2)
}
 0x11d   : > { %s2870_s7 = scalar_lea.vmem %s461_s23, 32  ;;  %p2878_p10 = scmp.lt.s32.totalorder %s461_s23, %s461_s23 }
 0x11e   : > { %p2871_p5 = scmp.ne.s32.totalorder %s461_s23, %s2870_s7  ;;  %p2879_p11 = scmp.lt.s32.totalorder %s2870_s7, %s2870_s7 }
 0x120   : > { %p2873_p7 = pnand %p2871_p5, %p3181_p8  ;;  %p2880_p12 = por %p2879_p11, %p2878_p10 }
 0x122   : > { %p2874_p9 = pneg %p2873_p7 }
 0x124   : > { %p2881_p4 = pnand %p2880_p12, %p2874_p9 }
 0x126   : > { %2884 = shalt.err (!%p2881_p4)
}
 0x127   : > { %2403 = dma.hbm_to_vmem [thread:$0]  (!%p3167_p6), %s3824_s10, 32, %s461_s23, [#allocation18]  }
 0x128   : > { %s3050_s22 = smov [#allocation22]   ;;  %s2885_s15 = scalar_lea.hbm %s3826_s12, 16 }
 0x129   : > { %s484_s20 = sshll.u32 %s3050_s22, 4  ;;  %p2886_p13 = scmp.ne.s32.totalorder %s3826_s12, %s2885_s15  ;;  %s485_s20 = int_to_ptr.vmem [resolvable:$true] %s484_s20 }
 0x12a   : > { %p2892_p3 = scmp.lt.u32.totalorder %s2885_s15, %s3826_s12 }
 0x12b   : > { %p2888_p0 = pnand %p2886_p13, %p3181_p8 }
 0x12d   : > { %p2889_p1 = pneg %p2888_p0 }
 0x12f   : > { %p2894_p2 = pnand %p2892_p3, %p2889_p1 }
 0x131   : > { %2897 = shalt.err (!%p2894_p2)
}
 0x132   : > { %s2898_s23 = scalar_lea.vmem %s485_s20, 16  ;;  %s2905_s29 = scalar_lea.vmem %s485_s20, 32 }
 0x133   : > { %p2899_p5 = scmp.ne.s32.totalorder %s485_s20, %s2898_s23  ;;  %p2906_p10 = scmp.lt.s32.totalorder %s485_s20, %s485_s20 }
 0x134   : > { %p2907_p11 = scmp.lt.s32.totalorder %s2905_s29, %s2898_s23 }
 0x135   : > { %p2901_p7 = pnand %p2899_p5, %p3181_p8 }
 0x136   : > { %p2908_p12 = por %p2907_p11, %p2906_p10 }
 0x137   : > { %p2902_p9 = pneg %p2901_p7 }
 0x139   : > { %p2909_p4 = pnand %p2908_p12, %p2902_p9 }
 0x13b   : > { %2912 = shalt.err (!%p2909_p4)
}
 0x13c   : > { %2409 = dma.hbm_to_vmem [thread:$0]  (!%p3167_p6), %s3826_s12, 16, %s485_s20, [#allocation21]  }
 0x13d   : > { %s1902_s16 = sadd.s32 4294967294, %s3033_s28   ;;  %s3419_s18 = sadd.s32 1, %s3033_s28  }
 0x13e   : > { %s39_s0 = ssub.s32 %s3033_s28, %s3419_s18  ;;  %s42_s22 = sadd.s32 1, %s3029_s27 }
 0x13f   : > { %p40_p8 = scmp.eq.s32.totalorder %s39_s0, 0  ;;  %p49_p13 = scmp.ne.s32.totalorder %s3029_s27, %s3025_s26 }
 0x140   : > { %p50_p0 = scmp.eq.s32.totalorder %s3033_s28, 0  ;;  %p55_p1 = scmp.ne.s32.totalorder %s3025_s26, %s3021_s25 }
 0x141   : > { %s3430_s19 = scalar_select %p40_p8, %s3029_s27, %s42_s22  }
 0x142   : > { %p3432_p3 = por %p50_p0, %p49_p13  ;;  %p3857_p2 = scmp.eq.s32.totalorder %s3149_s14, 0 }
 0x143   : > { %p331_p5 = scmp.eq.s32.totalorder %s3149_s14, 1  ;;  %p337_p7 = scmp.eq.s32.totalorder %s1902_s16, 1 }
 0x144   : > { %p3438_p6 = por %p3857_p2, %p55_p1  ;;  %p2430_p9 = scmp.lt.s32.totalorder %s3033_s28, 2 }
 0x145   : > { %s495_s15 = sand.u32 1, %s3029_s27   ;;  %p3445_p10 = por %p331_p5, %p49_p13 }
 0x146   : > { %p3449_p11 = por %p337_p7, %p55_p1  ;;  %s1917_s17 = sshll.u32 %s495_s15, 4 }
 0x147   : > { %s3859_s21 = scalar_select %p3445_p10, 1, 0 }
 0x148   : > { %s3860_s30 = scalar_select %p3449_p11, 1, 0 }
 0x149   : > { %s1979_s1 = sshll.u32 %s3033_s28, 8  ;;  %s3861_s7 = sld [smem:[#allocation33_spill]] }
 0x14a   : > { %s499_s16 = scalar_lea.vmem [#allocation2], %s1917_s17  ;;  %p3463_p12 = pnand %p2430_p9, %p3432_p3 }
 0x14b   : > { %s506_s0 = sshll.u32 %s499_s16, 4  ;;  %s3467_s2 = scalar_lea.sflag [#allocation3], %s495_s15  ;;  %s3459_s0 = int_to_ptr.vmem [resolvable:$true] %s506_s0 }
 0x14c   : > { %p2915_p8 = pneg %p3463_p12 }
 0x14f   : > { %s3457_s5 = scalar_lea.hbm %s3861_s7, %s1979_s1  ;;  %s2918_s13 = scalar_lea.hbm %s3861_s7, 512 }
 0x150   : > { %s2913_s23 = scalar_lea.hbm %s3457_s5, 256  ;;  %p2919_p1 = scmp.lt.u32.totalorder %s3457_s5, %s3861_s7 }
 0x151   : > { %p2914_p4 = scmp.ne.s32.totalorder %s3457_s5, %s2913_s23  ;;  %p2920_p3 = scmp.lt.u32.totalorder %s2918_s13, %s2913_s23 }
 0x152   : > { %p2922_p5 = scmp.lt.u32.totalorder %s2913_s23, %s3457_s5 }
 0x153   : > { %p2916_p13 = pnand %p2915_p8, %p2914_p4  ;;  %p2921_p2 = por %p2920_p3, %p2919_p1 }
 0x155   : > { %p2917_p0 = pneg %p2916_p13  ;;  %p2923_p7 = por %p2922_p5, %p2921_p2 }
 0x157   : > { %p2924_p9 = pnand %p2923_p7, %p2917_p0 }
 0x159   : > { %2927 = shalt.err (!%p2924_p9)
}
 0x15a   : > { %s2928_s15 = scalar_lea.vmem %s3459_s0, 256  ;;  %s3051_s17 = smov [#allocation2]  }
 0x15b   : > { %p2929_p4 = scmp.ne.s32.totalorder %s3459_s0, %s2928_s15  ;;  %s2933_s1 = sshll.u32 %s3051_s17, 4  ;;  %s2934_s1 = int_to_ptr.vmem [resolvable:$false] %s2933_s1 }
 0x15c   : > { %s2935_s29 = scalar_lea.vmem %s2934_s1, 512  ;;  %p2936_p10 = scmp.lt.s32.totalorder %s3459_s0, %s2934_s1 }
 0x15d   : > { %p2931_p13 = pnand %p2929_p4, %p2915_p8  ;;  %p2937_p1 = scmp.lt.s32.totalorder %s2935_s29, %s2928_s15 }
 0x15f   : > { %p2932_p11 = pneg %p2931_p13  ;;  %p2938_p3 = por %p2937_p1, %p2936_p10 }
 0x161   : > { %p2939_p2 = pnand %p2938_p3, %p2932_p11 }
 0x163   : > { %2942 = shalt.err (!%p2939_p2)
}
 0x164   : > { %2413 = dma.hbm_to_vmem [thread:$0]  (!%p3463_p12), %s3457_s5, 256, %s3459_s0, %s3467_s2, %s3854_s24, %s3854_s24, %s3853_s3  }
 0x165   : > { %s3863_s23 = sld [smem:[#allocation32_spill]] }
 0x16b   : > { %p3864_p8 = scmp.ne.s32.totalorder %s3863_s23, 0 }
 0x16c   : > { %s3501_s13 = sand.u32 (!%p3864_p8), 1, %s3025_s26  }
 0x16d   : > { %518 = sbr.rel (%p3864_p8) target bundleno = 1698 (0x6a2), region = 72  ;;  %s1921_s16 = sshll.u32 (!%p3864_p8), %s3501_s13, 4 }
 0x16e   : > { %s521_s15 = scalar_lea.sflag (!%p3864_p8), [#allocation3], %s3501_s13  ;;  %s524_s22 = scalar_lea.vmem (!%p3864_p8), [#allocation2], %s1921_s16 }
 0x174   : > { %2988 = dma.done.wait (%p3438_p6), %s521_s15, 256  }
 0x175   : > { %2990 = vsyncadd (%p3438_p6), %s521_s15, 4294967040  ;;  %p3865_p10 = scmp.eq.s32.totalorder %s3149_s14, 0 }
 0x177   : > { %2992 = dma.done.wait (%p3865_p10), [#allocation6], 32   ;;  %p3866_p11 = pmov %p3865_p10 }
 0x178   : > { %p3867_p12 = pmov %p3865_p10 }
 0x179   : > { %2994 = vsyncadd (%p3866_p11), [#allocation6], 4294967264 }
 0x17a   : > { %2996 = dma.done.wait (%p3867_p12), [#allocation9], 2064   ;;  %p3868_p0 = pmov %p3865_p10 }
 0x17c   : > { %2998 = vsyncadd (%p3868_p0), [#allocation9], 4294965232  ;;  %p3869_p5 = pmov %p3868_p0 }
 0x17d   : > { %p3870_p7 = pmov %p3868_p0 }
 0x17e   : > { %3000 = dma.done.wait (%p3869_p5), [#allocation12], 144  }
 0x17f   : > { %3002 = vsyncadd (%p3870_p7), [#allocation12], 4294967152  ;;  %p3871_p6 = pmov %p3868_p0 }
 0x180   : > { %p3872_p9 = pmov %p3868_p0 }
 0x181   : > { %3004 = dma.done.wait (%p3871_p6), [#allocation15], 32  }
 0x182   : > { %3006 = vsyncadd (%p3872_p9), [#allocation15], 4294967264  ;;  %p3873_p4 = pmov %p3868_p0 }
 0x183   : > { %p3874_p13 = pmov %p3868_p0 }
 0x184   : > { %3008 = dma.done.wait (%p3873_p4), [#allocation18], 4128  }
 0x185   : > { %3010 = vsyncadd (%p3874_p13), [#allocation18], 4294963168  ;;  %p3875_p1 = pmov %p3868_p0 }
 0x186   : > { %p3876_p3 = pmov %p3868_p0 }
 0x187   : > { %3012 = dma.done.wait (%p3875_p1), [#allocation21], 4112  }
 0x188   : > { %3014 = vsyncadd (%p3876_p3), [#allocation21], 4294963184  ;;  %v3535_v0 = vld [vmem:[%s524_s22 + $0x8] sm:$0xff]  ;;  %v3537_v1 = vld [vmem:[%s524_s22] sm:$0xff]  ;;  %vm757_vm0 = vcmask 64512   ;;  %v3052_v47 = vmov 0.0|0.0  }
 0x189   : > { %623 = vadd.xlane.f32.xlu1 %v3535_v0  ;;  %621 = vadd.xlane.f32.xlu0 %v3537_v1  ;;  %v629_v2 = vmul.f32 %v3535_v0, %v3535_v0  ;;  %v628_v3 = vmul.f32 %v3537_v1, %v3537_v1  ;;  %v664_v4 = vld [vmem:[#allocation8] sm:$0xff]  ;;  %v1935_v23 = vld [vmem:[#allocation5] ss:$0 sm:$0xff]  ;;  %v1936_v26 = vld [vmem:[#allocation7] ss:$0 sm:$0xff]  ;;  %vm3053_vm1 = vmmov 0  }
 0x18a   : > { %2089 = vmatprep.mubr.msk.f32.mxu0 %vm757_vm0, %v664_v4  ;;  %2150 = vmatprep.mubr.msk.f32.mxu1 %vm757_vm0, %v664_v4  ;;  %v1937_v5 = vld [vmem:[#allocation10] ss:$0 sm:$0xff]  ;;  %v665_v32 = vld [vmem:[#allocation8 + $0x8] sm:$0xff]  ;;  %v666_v33 = vld [vmem:[#allocation8 + $0x10] sm:$0xff]  ;;  %v3054_v48 = vmov 0.0   ;;  %s614_s2 = scalar_lea.vmem [#allocation23], %s1921_s16 }
 0x18b   : > { %v667_v34 = vld [vmem:[#allocation8 + $0x18] sm:$0xff]  ;;  %v668_v35 = vld [vmem:[#allocation8 + $0x20] sm:$0xff]  ;;  %v669_v36 = vld [vmem:[#allocation8 + $0x28] sm:$0xff]  ;;  %s1715_s3 = sshll.u32 %s614_s2, 4  ;;  %s1980_s24 = sshll.u32 %s3149_s14, 8  ;;  %s3764_s3 = int_to_ptr.vmem [resolvable:$true] %s1715_s3 }
 0x18c   : > { %v670_v37 = vld [vmem:[#allocation8 + $0x30] sm:$0xff]  ;;  %v671_v38 = vld [vmem:[#allocation8 + $0x38] sm:$0xff]  ;;  %v672_v39 = vld [vmem:[#allocation8 + $0x40] sm:$0xff]  ;;  %s3877_s0 = sld [smem:[#allocation39_spill]]  ;;  %s1702_s1 = scalar_lea.sflag [#allocation4], %s3501_s13 }
 0x18d   : > { %632 = vadd.xlane.f32.xlu1 %v629_v2  ;;  %630 = vadd.xlane.f32.xlu0 %v628_v3  ;;  %v673_v40 = vld [vmem:[#allocation8 + $0x48] sm:$0xff]  ;;  %v674_v41 = vld [vmem:[#allocation8 + $0x50] sm:$0xff]  ;;  %v675_v42 = vld [vmem:[#allocation8 + $0x58] sm:$0xff]  ;;  %s2943_s29 = scalar_lea.vmem %s3764_s3, 256  ;;  %p3878_p8 = scmp.ne.s32.totalorder %s3859_s21, 0 }
 0x18e   : > { %v676_v43 = vld [vmem:[#allocation8 + $0x60] sm:$0xff]  ;;  %v677_v44 = vld [vmem:[#allocation8 + $0x68] sm:$0xff]  ;;  %v678_v45 = vld [vmem:[#allocation8 + $0x70] sm:$0xff]  ;;  %p2944_p2 = scmp.ne.s32.totalorder %s3764_s3, %s2943_s29  ;;  %s3055_s14 = smov [#allocation23]  }
 0x18f   : > { %v679_v46 = vld [vmem:[#allocation8 + $0x78] sm:$0xff]  ;;  %v1938_v49 = vld [vmem:[#allocation13] ss:$0 sm:$0xff]  ;;  %s2947_s23 = sshll.u32 %s3055_s14, 4  ;;  %s2948_s23 = int_to_ptr.vmem [resolvable:$false] %s2947_s23 }
 0x190   : > { %p2945_p10 = pnand %p2944_p2, %p3878_p8  ;;  %s2949_s16 = scalar_lea.vmem %s2948_s23, 512 }
 0x191   : > { %p2950_p12 = scmp.lt.s32.totalorder %s3764_s3, %s2948_s23  ;;  %p2951_p0 = scmp.lt.s32.totalorder %s2949_s16, %s2943_s29 }
 0x192   : > { %s3769_s17 = scalar_lea.hbm %s3877_s0, %s1980_s24  ;;  %p2946_p11 = pneg %p2945_p10 }
 0x193   : > { %p2952_p5 = por %p2951_p0, %p2950_p12 }
 0x195   : > { %p2953_p7 = pnand %p2952_p5, %p2946_p11 }
 0x19e   : > { %691 = vbcast.lane.b32.xlu1 %v1937_v5, 264 }
 0x1a2   : > { %695 = vbcast.lane.b32.xlu1 %v1937_v5, 272 }
 0x1a3   : > { %687 = vbcast.lane.b32.xlu0 %v1937_v5, 256 }
 0x1a6   : > { %699 = vbcast.lane.b32.xlu1 %v1937_v5, 280 }
 0x1a7   : > { %703 = vbcast.lane.b32.xlu0 %v1937_v5, 288 }
 0x1aa   : > { %707 = vbcast.lane.b32.xlu1 %v1937_v5, 296 }
 0x1ab   : > { %711 = vbcast.lane.b32.xlu0 %v1937_v5, 304 }
 0x1ae   : > { %715 = vbcast.lane.b32.xlu1 %v1937_v5, 312 }
 0x1af   : > { %719 = vbcast.lane.b32.xlu0 %v1937_v5, 320 }
 0x1b2   : > { %723 = vbcast.lane.b32.xlu1 %v1937_v5, 328 }
 0x1b3   : > { %727 = vbcast.lane.b32.xlu0 %v1937_v5, 336 }
 0x1b6   : > { %731 = vbcast.lane.b32.xlu1 %v1937_v5, 344 }
 0x1b7   : > { %735 = vbcast.lane.b32.xlu0 %v1937_v5, 352 }
 0x1ba   : > { %739 = vbcast.lane.b32.xlu1 %v1937_v5, 360 }
 0x1bb   : > { %743 = vbcast.lane.b32.xlu0 %v1937_v5, 368 }
 0x1be   : > { %747 = vbcast.lane.b32.xlu1 %v1937_v5, 376 }
 0x1bf   : > { %755 = vbcast.lane.b32.xlu0 %v1938_v49, 256 }
 0x216   : > { %v624_v6 = vpop.xlane.xlu1 %623  ;;  %v622_v7 = vpop.xlane.xlu0 %621 }
 0x217   : > { %v627_v8 = vmul.f32 0.0078125, %v624_v6  ;;  %v626_v9 = vmul.f32 0.0078125, %v622_v7 }
 0x219   : > { %v636_v10 = vmul.f32 %v626_v9, %v626_v9  ;;  %v637_v13 = vmul.f32 %v627_v8, %v627_v8  ;;  %v645_v20 = vsub.f32 %v3535_v0, %v627_v8  ;;  %v644_v22 = vsub.f32 %v3537_v1, %v626_v9 }
 0x21a   : > { %v633_v11 = vpop.xlane.xlu1 %632  ;;  %v631_v12 = vpop.xlane.xlu0 %630 }
 0x21b   : > { %v635_v14 = vmul.f32 0.0078125, %v633_v11  ;;  %v634_v15 = vmul.f32 0.0078125, %v631_v12 }
 0x21d   : > { %v639_v16 = vsub.f32 %v635_v14, %v637_v13  ;;  %v638_v17 = vsub.f32 %v634_v15, %v636_v10 }
 0x21e   : > { %v692_v50 = vpop.permute.xlu1 %691  ;;  %v688_v53 = vpop.permute.xlu0 %687 }
 0x21f   : > { %v641_v18 = vadd.f32 1e-05, %v639_v16  ;;  %v640_v19 = vadd.f32 1e-05, %v638_v17 }
 0x221   : > { %2497 = vrsqrt.f32 %v641_v18 }
 0x222   : > { %2499 = vrsqrt.f32 %v640_v19  ;;  %v696_v51 = vpop.permute.xlu1 %695  ;;  %v704_v3 = vpop.permute.xlu0 %703 }
 0x226   : > { %v700_v52 = vpop.permute.xlu1 %699 }
 0x22a   : > { %v708_v2 = vpop.permute.xlu1 %707 }
 0x22b   : > { %v2498_v21 = vpop.eup %2497 }
 0x22c   : > { %v2500_v24 = vpop.eup %2499  ;;  %v647_v25 = vmul.f32 %v2498_v21, %v645_v20 }
 0x22d   : > { %v646_v27 = vmul.f32 %v2500_v24, %v644_v22 }
 0x22e   : > { %v655_v28 = vmul.f32 %v1935_v23, %v647_v25  ;;  %v716_v25 = vpop.permute.xlu1 %715 }
 0x22f   : > { %v654_v29 = vmul.f32 %v1935_v23, %v646_v27 }
 0x230   : > { %v663_v30 = vadd.f32 %v1936_v26, %v655_v28 }
 0x231   : > { %v662_v31 = vadd.f32 %v1936_v26, %v654_v29  ;;  %v712_v29 = vpop.permute.xlu0 %711 }
 0x232   : > { %2148 = vmatprep.subr.mxu1 %v663_v30 }
 0x233   : > { %2087 = vmatprep.subr.mxu0 %v662_v31  ;;  %2149 = vmatpush3.msra.mxu1 %v663_v30 }
 0x234   : > { %2088 = vmatpush3.msra.mxu0 %v662_v31  ;;  %2151 = vmatmul.mubr.msk.f32.vlgmr.msra.gmra.mrb[0].mxu1 %vm757_vm0, %v665_v32 }
 0x235   : > { %2090 = vmatmul.mubr.msk.f32.vlgmr.msra.gmra.mrb[0].mxu0 %vm757_vm0, %v665_v32  ;;  %2153 = vmatprep.mubr.msk.f32.mxu1 %vm757_vm0, %v666_v33 }
 0x236   : > { %2092 = vmatprep.mubr.msk.f32.mxu0 %vm757_vm0, %v666_v33  ;;  %2209 = vmatprep.subr.bf16.mxu0 %v3052_v47 }
 0x237   : > { %2233 = vmatprep.subr.bf16.mxu1 %v3052_v47 }
 0x238   : > { %2154 = vmatmul.mubr.msk.f32.gmra.mrb[2].mxu1 %vm757_vm0, %v667_v34 }
 0x239   : > { %2093 = vmatmul.mubr.msk.f32.gmra.mrb[2].mxu0 %vm757_vm0, %v667_v34  ;;  %2156 = vmatprep.mubr.msk.f32.mxu1 %vm757_vm0, %v668_v35 }
 0x23a   : > { %2095 = vmatprep.mubr.msk.f32.mxu0 %vm757_vm0, %v668_v35 }
 0x23c   : > { %2157 = vmatmul.mubr.msk.f32.gmra.mrb[4].mxu1 %vm757_vm0, %v669_v36 }
 0x23d   : > { %2096 = vmatmul.mubr.msk.f32.gmra.mrb[4].mxu0 %vm757_vm0, %v669_v36  ;;  %2159 = vmatprep.mubr.msk.f32.mxu1 %vm757_vm0, %v670_v37 }
 0x23e   : > { %2098 = vmatprep.mubr.msk.f32.mxu0 %vm757_vm0, %v670_v37 }
 0x240   : > { %2160 = vmatmul.mubr.msk.f32.gmra.mrb[6].mxu1 %vm757_vm0, %v671_v38 }
 0x241   : > { %2099 = vmatmul.mubr.msk.f32.gmra.mrb[6].mxu0 %vm757_vm0, %v671_v38  ;;  %2162 = vmatprep.mubr.msk.f32.mxu1 %vm757_vm0, %v672_v39 }
 0x242   : > { %2101 = vmatprep.mubr.msk.f32.mxu0 %vm757_vm0, %v672_v39 }
 0x244   : > { %2163 = vmatmul.mubr.msk.f32.gmra.mrb[8].mxu1 %vm757_vm0, %v673_v40 }
 0x245   : > { %2102 = vmatmul.mubr.msk.f32.gmra.mrb[8].mxu0 %vm757_vm0, %v673_v40  ;;  %2165 = vmatprep.mubr.msk.f32.mxu1 %vm757_vm0, %v674_v41 }
 0x246   : > { %2104 = vmatprep.mubr.msk.f32.mxu0 %vm757_vm0, %v674_v41 }
 0x248   : > { %2166 = vmatmul.mubr.msk.f32.gmra.mrb[10].mxu1 %vm757_vm0, %v675_v42 }
 0x249   : > { %2105 = vmatmul.mubr.msk.f32.gmra.mrb[10].mxu0 %vm757_vm0, %v675_v42  ;;  %2168 = vmatprep.mubr.msk.f32.mxu1 %vm757_vm0, %v676_v43 }
 0x24a   : > { %2107 = vmatprep.mubr.msk.f32.mxu0 %vm757_vm0, %v676_v43 }
 0x24c   : > { %2169 = vmatmul.mubr.msk.f32.gmra.mrb[12].mxu1 %vm757_vm0, %v677_v44 }
 0x24d   : > { %2108 = vmatmul.mubr.msk.f32.gmra.mrb[12].mxu0 %vm757_vm0, %v677_v44  ;;  %2171 = vmatprep.mubr.msk.f32.mxu1 %vm757_vm0, %v678_v45 }
 0x24e   : > { %2110 = vmatprep.mubr.msk.f32.mxu0 %vm757_vm0, %v678_v45 }
 0x250   : > { %2172 = vmatmul.mubr.msk.f32.gmra.mrb[14].mxu1 %vm757_vm0, %v679_v46 }
 0x251   : > { %2111 = vmatmul.mubr.msk.f32.gmra.mrb[14].mxu0 %vm757_vm0, %v679_v46  ;;  %2206 = vmatprep.mubr.msk.f32.mxu1 %vm3053_vm1, %v3054_v48 }
 0x252   : > { %2145 = vmatprep.mubr.msk.f32.mxu0 %vm3053_vm1, %v3054_v48 }
 0x307   : > { %v2152_v54 = vpop.f32.mrb[0].mxu1 }
 0x308   : > { %v1174_v55 = vadd.f32 %v2152_v54, %v692_v50  ;;  %v2091_v56 = vpop.f32.mrb[0].mxu0  ;;  %v1168_v57 = vpop.f32.mrb[1].mxu1 }
 0x309   : > { %v878_v58 = vadd.f32 %v2091_v56, %v692_v50  ;;  %v872_v59 = vpop.f32.mrb[1].mxu0  ;;  %v1169_v60 = vadd.f32 %v1168_v57, %v688_v53 }
 0x30a   : > { %v1264_v61 = vmul.f32 0.70710677, %v1174_v55  ;;  %v873_v62 = vadd.f32 %v872_v59, %v688_v53  ;;  %v1248_v30 = vmul.f32 0.5, %v1174_v55 }
 0x30b   : > { %v968_v63 = vmul.f32 0.70710677, %v878_v58  ;;  %v1263_v5 = vmul.f32 0.70710677, %v1169_v60  ;;  %v2155_v6 = vpop.f32.mrb[2].mxu1  ;;  %v952_v31 = vmul.f32 0.5, %v878_v58 }
 0x30c   : > { %2501 = verf.f32 %v1264_v61  ;;  %v967_v4 = vmul.f32 0.70710677, %v873_v62  ;;  %v2094_v7 = vpop.f32.mrb[2].mxu0  ;;  %v1184_v8 = vadd.f32 %v2155_v6, %v700_v52  ;;  %v1178_v11 = vpop.f32.mrb[3].mxu1  ;;  %v3583_v35 = vmul.f32 0.5, %v1169_v60 }
 0x30d   : > { %2503 = verf.f32 %v968_v63  ;;  %v888_v9 = vadd.f32 %v2094_v7, %v700_v52  ;;  %v882_v10 = vpop.f32.mrb[3].mxu0  ;;  %v1179_v13 = vadd.f32 %v1178_v11, %v696_v51  ;;  %v3585_v40 = vmul.f32 0.5, %v873_v62  ;;  %v724_v60 = vpop.permute.xlu1 %723 }
 0x30e   : > { %v883_v12 = vadd.f32 %v882_v10, %v696_v51  ;;  %2505 = verf.f32 %v967_v4  ;;  %v1266_v14 = vmul.f32 0.70710677, %v1184_v8  ;;  %v1250_v45 = vmul.f32 0.5, %v1184_v8 }
 0x30f   : > { %v2158_v15 = vpop.f32.mrb[4].mxu1  ;;  %2507 = verf.f32 %v1263_v5  ;;  %v970_v16 = vmul.f32 0.70710677, %v888_v9  ;;  %v1265_v18 = vmul.f32 0.70710677, %v1179_v13  ;;  %v954_v50 = vmul.f32 0.5, %v888_v9  ;;  %v720_v5 = vpop.permute.xlu0 %719 }
 0x310   : > { %v969_v17 = vmul.f32 0.70710677, %v883_v12  ;;  %2509 = verf.f32 %v1266_v14  ;;  %v1194_v19 = vadd.f32 %v2158_v15, %v708_v2  ;;  %v2097_v20 = vpop.f32.mrb[4].mxu0  ;;  %v1188_v21 = vpop.f32.mrb[5].mxu1  ;;  %v953_v56 = vmul.f32 0.5, %v883_v12 }
 0x311   : > { %2511 = verf.f32 %v970_v16  ;;  %v898_v22 = vadd.f32 %v2097_v20, %v708_v2  ;;  %v892_v23 = vpop.f32.mrb[5].mxu0  ;;  %v1189_v24 = vadd.f32 %v1188_v21, %v704_v3  ;;  %v1249_v57 = vmul.f32 0.5, %v1179_v13 }
 0x312   : > { %2513 = verf.f32 %v969_v17  ;;  %v1268_v26 = vmul.f32 0.70710677, %v1194_v19  ;;  %v893_v27 = vadd.f32 %v892_v23, %v704_v3  ;;  %v3591_v58 = vmul.f32 0.5, %v1194_v19 }
 0x313   : > { %v2161_v28 = vpop.f32.mrb[6].mxu1  ;;  %2515 = verf.f32 %v1265_v18  ;;  %v972_v32 = vmul.f32 0.70710677, %v898_v22  ;;  %v1267_v37 = vmul.f32 0.70710677, %v1189_v24  ;;  %v3593_v2 = vmul.f32 0.5, %v898_v22 }
 0x314   : > { %v2100_v33 = vpop.f32.mrb[6].mxu0  ;;  %v1198_v34 = vpop.f32.mrb[7].mxu1  ;;  %2517 = verf.f32 %v1268_v26  ;;  %v971_v36 = vmul.f32 0.70710677, %v893_v27  ;;  %v1204_v41 = vadd.f32 %v2161_v28, %v716_v25  ;;  %v3595_v3 = vmul.f32 0.5, %v893_v27 }
 0x315   : > { %v902_v38 = vpop.f32.mrb[7].mxu0  ;;  %2519 = verf.f32 %v972_v32  ;;  %v908_v42 = vadd.f32 %v2100_v33, %v716_v25  ;;  %v3587_v52 = vadd.f32 %v1198_v34, %v712_v29  ;;  %v3597_v4 = vmul.f32 0.5, %v1189_v24 }
 0x316   : > { %v2502_v39 = vpop.eup %2501  ;;  %2521 = verf.f32 %v971_v36  ;;  %v903_v46 = vadd.f32 %v902_v38, %v712_v29  ;;  %v1270_v51 = vmul.f32 0.70710677, %v1204_v41  ;;  %v3601_v8 = vmul.f32 0.5, %v1204_v41 }
 0x317   : > { %v2504_v43 = vpop.eup %2503  ;;  %v1296_v44 = vadd.f32 1.0, %v2502_v39  ;;  %v2164_v49 = vpop.f32.mrb[8].mxu1  ;;  %2523 = verf.f32 %v1267_v37  ;;  %v974_v59 = vmul.f32 0.70710677, %v908_v42  ;;  %v1269_v13 = vmul.f32 0.70710677, %v3587_v52 }
 0x318   : > { %v2103_v53 = vpop.f32.mrb[8].mxu0  ;;  %v3589_v54 = vpop.f32.mrb[9].mxu1  ;;  %v1000_v63 = vadd.f32 1.0, %v2504_v43  ;;  %2525 = verf.f32 %v1270_v51  ;;  %v973_v9 = vmul.f32 0.70710677, %v903_v46  ;;  %v1214_v14 = vadd.f32 %v2164_v49, %v724_v60 }
 0x319   : > { %v2506_v55 = vpop.eup %2505  ;;  %v912_v61 = vpop.f32.mrb[9].mxu0  ;;  %v3599_v7 = vmul.f32 %v1296_v44, %v1248_v30  ;;  %2527 = verf.f32 %v974_v59  ;;  %v918_v20 = vadd.f32 %v2103_v53, %v724_v60  ;;  %v3606_v26 = vmul.f32 0.5, %v908_v42 }
 0x31a   : > { %v2508_v62 = vpop.eup %2507  ;;  %v999_v18 = vadd.f32 1.0, %v2506_v55  ;;  %v913_v21 = vadd.f32 %v912_v61, %v720_v5  ;;  %v3604_v24 = vmul.f32 %v1000_v63, %v952_v31  ;;  %2529 = verf.f32 %v973_v9 }
 0x31b   : > { %v2510_v6 = vpop.eup %2509  ;;  %v2167_v10 = vpop.f32.mrb[10].mxu1  ;;  %v1272_v32 = vmul.f32 0.70710677, %v1214_v14  ;;  %v1295_v36 = vadd.f32 1.0, %v2508_v62  ;;  %2531 = verf.f32 %v1269_v13  ;;  %v976_v31 = vmul.f32 0.70710677, %v918_v20 }
 0x31c   : > { %v2512_v11 = vpop.eup %2511  ;;  %v1298_v12 = vadd.f32 1.0, %v2510_v6  ;;  %v2106_v15 = vpop.f32.mrb[10].mxu0  ;;  %v3622_v43 = vmul.f32 0.5, %v903_v46  ;;  %v975_v44 = vmul.f32 0.70710677, %v913_v21  ;;  %v1015_v51 = vmul.f32 %v999_v18, %v3585_v40 }
 0x31d   : > { %v1218_v16 = vpop.f32.mrb[11].mxu1  ;;  %v2514_v17 = vpop.eup %2513  ;;  %v1002_v19 = vadd.f32 1.0, %v2512_v11  ;;  %2533 = verf.f32 %v1272_v32  ;;  %v1209_v62 = vadd.f32 %v3589_v54, %v720_v5  ;;  %v3638_v13 = vmul.f32 0.5, %v3587_v52 }
 0x31e   : > { %v922_v22 = vpop.f32.mrb[11].mxu0  ;;  %v2516_v23 = vpop.eup %2515  ;;  %v1001_v25 = vadd.f32 1.0, %v2514_v17  ;;  %v3608_v28 = vmul.f32 %v1298_v12, %v1250_v45  ;;  %2535 = verf.f32 %v976_v31  ;;  %v1311_v12 = vmul.f32 %v1295_v36, %v3583_v35 }
 0x31f   : > { %v2518_v27 = vpop.eup %2517  ;;  %v3610_v29 = vmul.f32 %v1002_v19, %v954_v50  ;;  %v1297_v30 = vadd.f32 1.0, %v2516_v23  ;;  %v3612_v33 = vpop.f32.mrb[12].mxu1  ;;  %2537 = verf.f32 %v975_v44  ;;  %v3640_v17 = vmul.f32 0.5, %v1214_v14 }
 0x320   : > { %v2520_v34 = vpop.eup %2519  ;;  %v3614_v37 = vmul.f32 %v1001_v25, %v953_v56  ;;  %v3616_v38 = vpop.f32.mrb[12].mxu0  ;;  %v1300_v55 = vadd.f32 1.0, %v2518_v27  ;;  %v3644_v25 = vmul.f32 0.5, %v918_v20  ;;  %v3646_v54 = vmul.f32 0.5, %v913_v21 }
 0x321   : > { %v3618_v39 = vpop.f32.mrb[13].mxu1  ;;  %v2522_v41 = vpop.eup %2521  ;;  %v3620_v42 = vmul.f32 %v1297_v30, %v1249_v57  ;;  %v1004_v57 = vadd.f32 1.0, %v2520_v34  ;;  %v1271_v5 = vmul.f32 0.70710677, %v1209_v62  ;;  %v3660_v34 = vmul.f32 0.5, %v1209_v62 }
 0x322   : > { %v732_v45 = vpop.permute.xlu1 %731  ;;  %v932_v49 = vpop.f32.mrb[13].mxu0  ;;  %v2213_v53 = vpack.c.bf16 %v3610_v29, %v3614_v37  ;;  %v1003_v60 = vadd.f32 1.0, %v2522_v41 }
 0x323   : > { %v2524_v50 = vpop.eup %2523  ;;  %v728_v56 = vpop.permute.xlu0 %727  ;;  %v2237_v59 = vpack.c.bf16 %v3608_v28, %v3620_v42  ;;  %v1224_v63 = vadd.f32 %v2167_v10, %v732_v45  ;;  %v928_v6 = vadd.f32 %v2106_v15, %v732_v45  ;;  %v3649_v15 = vmul.f32 %v1300_v55, %v3591_v58 }
 0x324   : > { %v3629_v46 = vpop.f32.mrb[14].mxu1  ;;  %v1299_v61 = vadd.f32 1.0, %v2524_v50  ;;  %v3632_v40 = vpop.f32.mrb[14].mxu0  ;;  %v923_v18 = vadd.f32 %v922_v22, %v728_v56  ;;  %v1219_v10 = vadd.f32 %v1218_v16, %v728_v56  ;;  %v3652_v35 = vmul.f32 %v1004_v57, %v3593_v2 }
 0x325   : > { %v3634_v9 = vpop.f32.mrb[15].mxu1  ;;  %v2526_v11 = vpop.eup %2525  ;;  %v1274_v52 = vmul.f32 0.70710677, %v1224_v63  ;;  %v978_v27 = vmul.f32 0.70710677, %v928_v6  ;;  %v3655_v22 = vmul.f32 %v1003_v60, %v3595_v3  ;;  %2539 = verf.f32 %v1271_v5 }
 0x326   : > { %v3642_v19 = vpop.f32.mrb[15].mxu0  ;;  %v2528_v23 = vpop.eup %2527  ;;  %v3658_v30 = vmul.f32 %v1299_v61, %v3597_v4  ;;  %v1302_v20 = vadd.f32 1.0, %v2526_v11  ;;  %v977_v58 = vmul.f32 0.70710677, %v923_v18  ;;  %v3662_v36 = vmul.f32 0.5, %v1224_v63 }
 0x327   : > { %v2530_v14 = vpop.eup %2529  ;;  %v740_v21 = vpop.permute.xlu1 %739  ;;  %v1006_v16 = vadd.f32 1.0, %v2528_v23  ;;  %2541 = verf.f32 %v1274_v52  ;;  %v1273_v31 = vmul.f32 0.70710677, %v1219_v10  ;;  %v2210_v3 = vpack.c.bf16 %v3604_v24, %v1015_v51 }
 0x328   : > { %v736_v32 = vpop.permute.xlu0 %735  ;;  %v2532_v2 = vpop.eup %2531  ;;  %2543 = verf.f32 %v978_v27  ;;  %v1005_v44 = vadd.f32 1.0, %v2530_v14  ;;  %v2234_v4 = vpack.c.bf16 %v3599_v7, %v1311_v12  ;;  %v3667_v45 = vadd.f32 %v3612_v33, %v740_v21 }
 0x329   : > { %v2534_v41 = vpop.eup %2533  ;;  %2545 = verf.f32 %v977_v58  ;;  %v3670_v55 = vmul.f32 %v1302_v20, %v3601_v8  ;;  %2211 = vmatpush3.bf16.msra.mxu0 %v2210_v3  ;;  %v3673_v56 = vadd.f32 %v3616_v38, %v740_v21  ;;  %v3675_v57 = vadd.f32 %v932_v49, %v736_v32 }
 0x32a   : > { %v2536_v50 = vpop.eup %2535  ;;  %2547 = verf.f32 %v1273_v31  ;;  %v3678_v51 = vmul.f32 %v1006_v16, %v3606_v26  ;;  %v962_v60 = vmul.f32 0.5, %v928_v6  ;;  %2235 = vmatpush3.bf16.msra.mxu1 %v2234_v4  ;;  %v1276_v7 = vmul.f32 0.70710677, %v3667_v45  ;;  %2212 = vmatprep.subr.bf16.mxu0 %v3052_v47 }
 0x32b   : > { %v2538_v24 = vpop.eup %2537  ;;  %v3682_v33 = vadd.f32 %v3618_v39, %v736_v32  ;;  %v1301_v8 = vadd.f32 1.0, %v2532_v2  ;;  %v961_v61 = vmul.f32 0.5, %v923_v18  ;;  %v1257_v62 = vmul.f32 0.5, %v1219_v10  ;;  %2236 = vmatprep.subr.bf16.mxu1 %v3052_v47  ;;  %v748_v49 = vpop.permute.xlu1 %747 }
 0x32c   : > { %v980_v38 = vmul.f32 0.70710677, %v3673_v56  ;;  %v744_v63 = vpop.permute.xlu0 %743  ;;  %v1021_v26 = vmul.f32 %v1005_v44, %v3622_v43  ;;  %v1008_v6 = vadd.f32 1.0, %v2536_v50  ;;  %2549 = verf.f32 %v1276_v7 }
 0x32d   : > { %v979_v11 = vmul.f32 0.70710677, %v3675_v57  ;;  %v1304_v12 = vadd.f32 1.0, %v2534_v41  ;;  %v1007_v39 = vadd.f32 1.0, %v2538_v24  ;;  %v1275_v23 = vmul.f32 0.70710677, %v3682_v33  ;;  %2214 = vmatpush3.bf16.msra.mxu0 %v2213_v53 }
 0x32e   : > { %2551 = verf.f32 %v980_v38  ;;  %2238 = vmatpush3.bf16.msra.mxu1 %v2237_v59  ;;  %v3697_v43 = vadd.f32 %v3629_v46, %v748_v49  ;;  %v3700_v18 = vadd.f32 %v3632_v40, %v748_v49  ;;  %v3703_v5 = vadd.f32 %v3642_v19, %v744_v63  ;;  %2215 = vmatprep.subr.bf16.mxu0 %v3052_v47 }
 0x32f   : > { %2553 = verf.f32 %v979_v11  ;;  %v2540_v10 = vpop.eup %2539  ;;  %v3707_v29 = vadd.f32 %v3634_v9, %v744_v63  ;;  %2239 = vmatprep.subr.bf16.mxu1 %v3052_v47  ;;  %v2216_v28 = vpack.c.bf16 %v3652_v35, %v3655_v22  ;;  %v2240_v37 = vpack.c.bf16 %v3649_v15, %v3658_v30 }
 0x330   : > { %2555 = verf.f32 %v1275_v23  ;;  %v1317_v53 = vmul.f32 %v1301_v8, %v3638_v13  ;;  %v1024_v59 = vmul.f32 %v1008_v6, %v3644_v25  ;;  %v1303_v46 = vadd.f32 1.0, %v2540_v10 }
 0x331   : > { %v2542_v42 = vpop.eup %2541  ;;  %v1278_v40 = vmul.f32 0.70710677, %v3697_v43  ;;  %v1023_v9 = vmul.f32 %v1007_v39, %v3646_v54  ;;  %v982_v27 = vmul.f32 0.70710677, %v3700_v18  ;;  %v981_v14 = vmul.f32 0.70710677, %v3703_v5  ;;  %2217 = vmatpush3.bf16.msra.mxu0 %v2216_v28 }
 0x332   : > { %v2544_v19 = vpop.eup %2543  ;;  %v1306_v52 = vadd.f32 1.0, %v2542_v42  ;;  %v1320_v15 = vmul.f32 %v1304_v12, %v3640_v17  ;;  %v1319_v22 = vmul.f32 %v1303_v46, %v3660_v34  ;;  %2241 = vmatpush3.bf16.msra.mxu1 %v2240_v37  ;;  %2218 = vmatprep.subr.bf16.mxu0 %v3052_v47  ;;  %v1277_v20 = vmul.f32 0.70710677, %v3707_v29 }
 0x333   : > { %v2546_v35 = vpop.eup %2545  ;;  %v1010_v13 = vadd.f32 1.0, %v2544_v19  ;;  %2557 = verf.f32 %v1278_v40  ;;  %2242 = vmatprep.subr.bf16.mxu1 %v3052_v47  ;;  %v2219_v17 = vpack.c.bf16 %v3678_v51, %v1021_v26  ;;  %v2243_v34 = vpack.c.bf16 %v3670_v55, %v1317_v53  ;;  %v680_v19 = vld [vmem:[#allocation11] sm:$0xff] }
 0x334   : > { %v2548_v25 = vpop.eup %2547  ;;  %v1322_v30 = vmul.f32 %v1306_v52, %v3662_v36  ;;  %v1009_v54 = vadd.f32 1.0, %v2546_v35  ;;  %2559 = verf.f32 %v982_v27  ;;  %v2222_v58 = vpack.c.bf16 %v1024_v59, %v1023_v9  ;;  %v1445_v9 = vld [vmem:[#allocation17 + $0x18] sm:$0xff]  ;;  %v1442_v52 = vld [vmem:[#allocation17] sm:$0xff]  ;;  %v1447_v35 = vld [vmem:[#allocation17 + $0x28] sm:$0xff] }
 0x335   : > { %v1026_v21 = vmul.f32 %v1010_v13, %v962_v60  ;;  %v1305_v32 = vadd.f32 1.0, %v2548_v25  ;;  %2561 = verf.f32 %v981_v14  ;;  %2220 = vmatpush3.bf16.msra.mxu0 %v2219_v17  ;;  %v2246_v36 = vpack.c.bf16 %v1320_v15, %v1319_v22  ;;  %v1444_v14 = vld [vmem:[#allocation17 + $0x10] sm:$0xff]  ;;  %v1449_v15 = vld [vmem:[#allocation17 + $0x38] sm:$0xff] }
 0x336   : > { %v1025_v16 = vmul.f32 %v1009_v54, %v961_v61  ;;  %2563 = verf.f32 %v1277_v20  ;;  %v2550_v2 = vpop.eup %2549  ;;  %2244 = vmatpush3.bf16.msra.mxu1 %v2243_v34  ;;  %2221 = vmatprep.subr.bf16.mxu0 %v3052_v47  ;;  %v1260_v50 = vmul.f32 0.5, %v3667_v45  ;;  %v964_v24 = vmul.f32 0.5, %v3673_v56 }
 0x337   : > { %v1321_v31 = vmul.f32 %v1305_v32, %v1257_v62  ;;  %v1308_v41 = vadd.f32 1.0, %v2550_v2  ;;  %2245 = vmatprep.subr.bf16.mxu1 %v3052_v47  ;;  %v963_v7 = vmul.f32 0.5, %v3675_v57  ;;  %v1259_v38 = vmul.f32 0.5, %v3682_v33  ;;  %v1446_v2 = vld [vmem:[#allocation17 + $0x20] sm:$0xff] }
 0x338   : > { %v2552_v3 = vpop.eup %2551  ;;  %v2225_v44 = vpack.c.bf16 %v1026_v21, %v1025_v16  ;;  %v1262_v57 = vmul.f32 0.5, %v3697_v43  ;;  %v966_v39 = vmul.f32 0.5, %v3700_v18  ;;  %v965_v28 = vmul.f32 0.5, %v3703_v5 }
 0x339   : > { %v2554_v4 = vpop.eup %2553  ;;  %v1012_v51 = vadd.f32 1.0, %v2552_v3  ;;  %v2249_v55 = vpack.c.bf16 %v1322_v30, %v1321_v31  ;;  %v1324_v61 = vmul.f32 %v1308_v41, %v1260_v50  ;;  %2223 = vmatpush3.bf16.msra.mxu0 %v2222_v58  ;;  %v1261_v59 = vmul.f32 0.5, %v3707_v29  ;;  %v1443_v29 = vld [vmem:[#allocation17 + $0x8] sm:$0xff]  ;;  %v1448_v31 = vld [vmem:[#allocation17 + $0x30] sm:$0xff]  ;;  %v1453_v3 = vld [vmem:[#allocation17 + $0x58] sm:$0xff] }
 0x33a   : > { %v2556_v60 = vpop.eup %2555  ;;  %v1011_v8 = vadd.f32 1.0, %v2554_v4  ;;  %2247 = vmatpush3.bf16.msra.mxu1 %v2246_v36  ;;  %2224 = vmatprep.subr.bf16.mxu0 %v3052_v47  ;;  %v2257_v27 = vpack.c.bf16 %v1445_v9, %v1443_v29  ;;  %v2259_v22 = vpack.c.bf16 %v1444_v14, %v1442_v52  ;;  %v2261_v13 = vpack.c.bf16 %v1449_v15, %v1447_v35  ;;  %v1450_v41 = vld [vmem:[#allocation17 + $0x40] sm:$0xff]  ;;  %v1455_v50 = vld [vmem:[#allocation17 + $0x68] sm:$0xff]  ;;  %v1492_v9 = vld [vmem:[#allocation20 + $0x90] sm:$0xff] }
 0x33b   : > { %v1028_v62 = vmul.f32 %v1012_v51, %v964_v24  ;;  %v1307_v49 = vadd.f32 1.0, %v2556_v60  ;;  %2248 = vmatprep.subr.bf16.mxu1 %v3052_v47  ;;  %v2263_v36 = vpack.c.bf16 %v1448_v31, %v1446_v2  ;;  %v1457_v24 = vld [vmem:[#allocation17 + $0x78] sm:$0xff]  ;;  %v1456_v60 = vld [vmem:[#allocation17 + $0x70] sm:$0xff] }
 0x33c   : > { %v1027_v63 = vmul.f32 %v1011_v8, %v963_v7  ;;  %v2269_v51 = vpack.c.bf16 %v1457_v24, %v1455_v50  ;;  %v1459_v8 = vld [vmem:[#allocation17 + $0x88] sm:$0xff]  ;;  %v1493_v52 = vld [vmem:[#allocation20 + $0x98] sm:$0xff]  ;;  %v1476_v35 = vld [vmem:[#allocation20 + $0x10] sm:$0xff] }
 0x33d   : > { %v2558_v45 = vpop.eup %2557  ;;  %v1323_v56 = vmul.f32 %v1307_v49, %v1259_v38  ;;  %2226 = vmatpush3.bf16.msra.mxu0 %v2225_v44  ;;  %v1452_v44 = vld [vmem:[#allocation17 + $0x50] sm:$0xff]  ;;  %v1458_v38 = vld [vmem:[#allocation17 + $0x80] sm:$0xff]  ;;  %v2293_v14 = vpack.c.bf16 %v1493_v52, %v1492_v9 }
 0x33e   : > { %v2560_v26 = vpop.eup %2559  ;;  %v1310_v6 = vadd.f32 1.0, %v2558_v45  ;;  %v2228_v11 = vpack.c.bf16 %v1028_v62, %v1027_v63  ;;  %2250 = vmatpush3.bf16.msra.mxu1 %v2249_v55  ;;  %2227 = vmatprep.subr.bf16.mxu0 %v3052_v47  ;;  %v2267_v4 = vpack.c.bf16 %v1452_v44, %v1450_v41  ;;  %v1454_v55 = vld [vmem:[#allocation17 + $0x60] sm:$0xff]  ;;  %v1460_v49 = vld [vmem:[#allocation17 + $0x90] sm:$0xff]  ;;  %v1463_v45 = vld [vmem:[#allocation17 + $0xa8] sm:$0xff] }
 0x33f   : > { %v2562_v12 = vpop.eup %2561  ;;  %v1014_v23 = vadd.f32 1.0, %v2560_v26  ;;  %v2252_v33 = vpack.c.bf16 %v1324_v61, %v1323_v56  ;;  %2251 = vmatprep.subr.bf16.mxu1 %v3052_v47  ;;  %v2271_v7 = vpack.c.bf16 %v1456_v60, %v1454_v55  ;;  %v1461_v61 = vld [vmem:[#allocation17 + $0x98] sm:$0xff]  ;;  %v2275_v63 = vpack.c.bf16 %v1460_v49, %v1458_v38  ;;  %v1475_v29 = vld [vmem:[#allocation20 + $0x8] sm:$0xff] }
 0x340   : > { %v2564_v10 = vpop.eup %2563  ;;  %v1013_v37 = vadd.f32 1.0, %v2562_v12  ;;  %v1326_v42 = vmul.f32 %v1310_v6, %v1262_v57  ;;  %v2273_v62 = vpack.c.bf16 %v1461_v61, %v1459_v8  ;;  %v1465_v56 = vld [vmem:[#allocation17 + $0xb8] sm:$0xff]  ;;  %v1462_v6 = vld [vmem:[#allocation17 + $0xa0] sm:$0xff]  ;;  %v1467_v57 = vld [vmem:[#allocation17 + $0xc8] sm:$0xff] }
 0x341   : > { %v1030_v53 = vmul.f32 %v1014_v23, %v966_v39  ;;  %v1309_v46 = vadd.f32 1.0, %v2564_v10  ;;  %2229 = vmatpush3.bf16.msra.mxu0 %v2228_v11  ;;  %v2277_v26 = vpack.c.bf16 %v1465_v56, %v1463_v45  ;;  %v1464_v11 = vld [vmem:[#allocation17 + $0xb0] sm:$0xff]  ;;  %v1469_v39 = vld [vmem:[#allocation17 + $0xd8] sm:$0xff]  ;;  %v1466_v23 = vld [vmem:[#allocation17 + $0xc0] sm:$0xff] }
 0x342   : > { %v1029_v43 = vmul.f32 %v1013_v37, %v965_v28  ;;  %2253 = vmatpush3.bf16.msra.mxu1 %v2252_v33  ;;  %2230 = vmatprep.subr.bf16.mxu0 %v3052_v47  ;;  %v2279_v12 = vpack.c.bf16 %v1464_v11, %v1462_v6  ;;  %v2281_v33 = vpack.c.bf16 %v1469_v39, %v1467_v57  ;;  %v1468_v10 = vld [vmem:[#allocation17 + $0xd0] sm:$0xff]  ;;  %v1471_v28 = vld [vmem:[#allocation17 + $0xe8] sm:$0xff]  ;;  %v1473_v37 = vld [vmem:[#allocation17 + $0xf8] sm:$0xff] }
 0x343   : > { %v1325_v40 = vmul.f32 %v1309_v46, %v1261_v59  ;;  %2254 = vmatprep.subr.bf16.mxu1 %v3052_v47  ;;  %v756_v47 = vpop.permute.xlu0 %755  ;;  %v1470_v59 = vld [vmem:[#allocation17 + $0xe0] sm:$0xff]  ;;  %v1472_v46 = vld [vmem:[#allocation17 + $0xf0] sm:$0xff]  ;;  %v1971_v55 = vld [vmem:[#allocation14] ss:$0 sm:$0xff] }
 0x344   : > { %v2231_v18 = vpack.c.bf16 %v1030_v53, %v1029_v43  ;;  %v2285_v53 = vpack.c.bf16 %v1473_v37, %v1471_v28  ;;  %v2287_v43 = vpack.c.bf16 %v1472_v46, %v1470_v59  ;;  %v1477_v15 = vld [vmem:[#allocation20 + $0x18] sm:$0xff]  ;;  %v1496_v56 = vld [vmem:[#allocation20 + $0xb0] sm:$0xff]  ;;  %v1498_v39 = vld [vmem:[#allocation20 + $0xc0] sm:$0xff] }
 0x345   : > { %v2255_v5 = vpack.c.bf16 %v1326_v42, %v1325_v40  ;;  %v2283_v42 = vpack.c.bf16 %v1468_v10, %v1466_v23  ;;  %v1490_v40 = vld [vmem:[#allocation20 + $0x80] sm:$0xff]  ;;  %v1480_v11 = vld [vmem:[#allocation20 + $0x30] sm:$0xff]  ;;  %v1499_v23 = vld [vmem:[#allocation20 + $0xc8] sm:$0xff] }
 0x346   : > { %2232 = vmatpush3.bf16.msra.mxu0 %v2231_v18  ;;  %v1491_v18 = vld [vmem:[#allocation20 + $0x88] sm:$0xff]  ;;  %v1482_v10 = vld [vmem:[#allocation20 + $0x40] sm:$0xff]  ;;  %v1484_v59 = vld [vmem:[#allocation20 + $0x50] sm:$0xff] }
 0x347   : > { %2256 = vmatpush3.bf16.msra.mxu1 %v2255_v5  ;;  %2258 = vmatprep.subr.bf16.mxu0 %v2257_v27  ;;  %v1474_v5 = vld [vmem:[#allocation20] sm:$0xff]  ;;  %v1483_v28 = vld [vmem:[#allocation20 + $0x48] sm:$0xff]  ;;  %v1485_v46 = vld [vmem:[#allocation20 + $0x58] sm:$0xff] }
 0x348   : > { %v2291_v27 = vpack.c.bf16 %v1475_v29, %v1474_v5  ;;  %v2307_v37 = vpack.c.bf16 %v1483_v28, %v1482_v10  ;;  %v1487_v29 = vld [vmem:[#allocation20 + $0x68] sm:$0xff]  ;;  %v1504_v52 = vld [vmem:[#allocation20 + $0xf0] sm:$0xff] }
 0x349   : > { %2146 = vmatmul.mubr.f32.vlgmr.msra.gmra.mrb[16].mxu0 %v680_v19 }
 0x34a   : > { %2207 = vmatmul.mubr.f32.vlgmr.msra.gmra.mrb[16].mxu1 %v680_v19  ;;  %1582 = vmatprep.mubr.f32.mxu0 %v3054_v48  ;;  %v2289_v19 = vpack.c.bf16 %v1491_v18, %v1490_v40  ;;  %v1502_v40 = vld [vmem:[#allocation20 + $0xe0] sm:$0xff]  ;;  %v1503_v18 = vld [vmem:[#allocation20 + $0xe8] sm:$0xff] }
 0x34b   : > { %2260 = vmatpush1.bf16.msra.mxu0 %v2259_v22  ;;  %v1494_v22 = vld [vmem:[#allocation20 + $0xa0] sm:$0xff]  ;;  %v2313_v5 = vpack.c.bf16 %v1503_v18, %v1502_v40 }
 0x34c   : > { %2262 = vmatprep.subr.bf16.mxu0 %v2261_v13  ;;  %2290 = vmatprep.subr.bf16.mxu1 %v2289_v19  ;;  %v1495_v13 = vld [vmem:[#allocation20 + $0xa8] sm:$0xff]  ;;  %v1486_v19 = vld [vmem:[#allocation20 + $0x60] sm:$0xff] }
 0x34d   : > { %2292 = vmatpush3.bf16.msra.mxu1 %v2291_v27  ;;  %v2315_v9 = vpack.c.bf16 %v1487_v29, %v1486_v19  ;;  %v1505_v27 = vld [vmem:[#allocation20 + $0xf8] sm:$0xff] }
 0x34e   : > { %2294 = vmatprep.subr.bf16.mxu1 %v2293_v14  ;;  %v2317_v14 = vpack.c.bf16 %v1505_v27, %v1504_v52 }
 0x34f   : > { %2264 = vmatpush1.bf16.msra.mxu0 %v2263_v36 }
 0x41c   : > { %v1097_v25 = vpop.f32.mrb[16].mxu0 }
 0x41d   : > { %v1393_v30 = vpop.f32.mrb[16].mxu1  ;;  %v1098_v54 = vadd.f32 %v1097_v25, %v756_v47  ;;  %v2147_v20 = vpop.f32.mrb[17].mxu0  ;;  %v2297_v25 = vpack.c.bf16 %v1495_v13, %v1494_v22  ;;  %v1508_v13 = vlaneseq }
 0x41e   : > { %v1394_v21 = vadd.f32 %v1393_v30, %v756_v47  ;;  %v2208_v32 = vpop.f32.mrb[17].mxu1  ;;  %v2295_v47 = vpack.c.bf16 %v1477_v15, %v1476_v35  ;;  %v1478_v30 = vld [vmem:[#allocation20 + $0x20] sm:$0xff]  ;;  %v1488_v35 = vld [vmem:[#allocation20 + $0x70] sm:$0xff]  ;;  %v1489_v15 = vld [vmem:[#allocation20 + $0x78] sm:$0xff] }
 0x41f   : > { %v3746_v17 = vadd.f32 %v1098_v54, %v3537_v1  ;;  %v1451_v1 = vld [vmem:[#allocation17 + $0x48] sm:$0xff]  ;;  %v2319_v22 = vpack.c.bf16 %v1489_v15, %v1488_v35 }
 0x420   : > { %v3749_v16 = vadd.f32 %v1394_v21, %v3535_v0  ;;  %v2265_v0 = vpack.c.bf16 %v1453_v3, %v1451_v1  ;;  %v1479_v54 = vld [vmem:[#allocation20 + $0x28] sm:$0xff]  ;;  %2296 = vmatpush3.bf16.msra.mxu1 %v2295_v47  ;;  %v1509_v47 = vshrl.u32 %v1508_v13, 7 }
 0x421   : > { %1400 = vadd.xlane.f32.xlu1 %v3746_v17  ;;  %v1406_v34 = vmul.f32 %v3746_v17, %v3746_v17  ;;  %v2299_v20 = vpack.c.bf16 %v1479_v54, %v1478_v30  ;;  %2298 = vmatprep.subr.bf16.mxu1 %v2297_v25  ;;  %v1506_v30 = vld [vmem:[#allocation19] sm:$0x3] }
 0x422   : > { %1402 = vadd.xlane.f32.xlu0 %v3749_v16  ;;  %v1407_v58 = vmul.f32 %v3749_v16, %v3749_v16  ;;  %2266 = vmatprep.subr.bf16.mxu0 %v2265_v0  ;;  %v1510_v25 = vsub.s32 0, %v1509_v47  ;;  %v1514_v54 = vsub.s32 1, %v1509_v47 }
 0x423   : > { %2268 = vmatpush1.bf16.msra.mxu0 %v2267_v4 }
 0x424   : > { %2270 = vmatprep.subr.bf16.mxu0 %v2269_v51  ;;  %2300 = vmatpush3.bf16.msra.mxu1 %v2299_v20  ;;  %v1511_v20 = vrot.slane %v1506_v30, %v1510_v25 }
 0x426   : > { %1408 = vadd.xlane.f32.xlu0 %v1406_v34 }
 0x427   : > { %2272 = vmatpush1.bf16.msra.mxu0 %v2271_v7  ;;  %v1972_v7 = vld [vmem:[#allocation16] ss:$0 sm:$0xff] }
 0x428   : > { %2274 = vmatprep.subr.bf16.mxu0 %v2273_v62 }
 0x42a   : > { %1410 = vadd.xlane.f32.xlu0 %v1407_v58 }
 0x42b   : > { %2276 = vmatpush1.bf16.msra.mxu0 %v2275_v63 }
 0x42c   : > { %2278 = vmatprep.subr.bf16.mxu0 %v2277_v26  ;;  %v1497_v26 = vld [vmem:[#allocation20 + $0xb8] sm:$0xff] }
 0x42d   : > { %v2301_v6 = vpack.c.bf16 %v1497_v26, %v1496_v56 }
 0x42f   : > { %2280 = vmatpush1.bf16.msra.mxu0 %v2279_v12  ;;  %v1481_v12 = vld [vmem:[#allocation20 + $0x38] sm:$0xff]  ;;  %2302 = vmatprep.subr.bf16.mxu1 %v2301_v6 }
 0x430   : > { %2282 = vmatprep.subr.bf16.mxu0 %v2281_v33  ;;  %v2303_v57 = vpack.c.bf16 %v1481_v12, %v1480_v11  ;;  %v2305_v33 = vpack.c.bf16 %v1499_v23, %v1498_v39  ;;  %v1973_v12 = vld [vmem:[#allocation22] ss:$0 sm:$0xff] }
 0x432   : > { %2304 = vmatpush3.bf16.msra.mxu1 %v2303_v57 }
 0x433   : > { %2284 = vmatpush1.bf16.msra.mxu0 %v2283_v42  ;;  %2306 = vmatprep.subr.bf16.mxu1 %v2305_v33  ;;  %v1500_v42 = vld [vmem:[#allocation20 + $0xd0] sm:$0xff] }
 0x434   : > { %2286 = vmatprep.subr.bf16.mxu0 %v2285_v53 }
 0x436   : > { %2308 = vmatpush3.bf16.msra.mxu1 %v2307_v37 }
 0x437   : > { %2288 = vmatpush1.bf16.msra.mxu0 %v2287_v43  ;;  %v2311_v43 = vpack.c.bf16 %v1485_v46, %v1484_v59 }
 0x4ae   : > { %v1401_v21 = vpop.xlane.xlu1 %1400 }
 0x4af   : > { %v1403_v32 = vpop.xlane.xlu0 %1402  ;;  %v1404_v34 = vmul.f32 0.0078125, %v1401_v21  ;;  %v1515_v21 = vrot.slane %v1506_v30, %v1514_v54 }
 0x4b0   : > { %v1405_v2 = vmul.f32 0.0078125, %v1403_v32 }
 0x4b1   : > { %v1414_v31 = vmul.f32 %v1404_v34, %v1404_v34  ;;  %v1422_v24 = vsub.f32 %v3746_v17, %v1404_v34 }
 0x4b2   : > { %v1415_v0 = vmul.f32 %v1405_v2, %v1405_v2  ;;  %v1423_v8 = vsub.f32 %v3749_v16, %v1405_v2 }
 0x4b3   : > { %v1409_v58 = vpop.xlane.xlu0 %1408 }
 0x4b4   : > { %v1412_v36 = vmul.f32 0.0078125, %v1409_v58 }
 0x4b6   : > { %v1416_v1 = vsub.f32 %v1412_v36, %v1414_v31 }
 0x4b7   : > { %v1411_v3 = vpop.xlane.xlu0 %1410 }
 0x4b8   : > { %v1418_v41 = vadd.f32 1e-05, %v1416_v1  ;;  %v1413_v44 = vmul.f32 0.0078125, %v1411_v3 }
 0x4ba   : > { %2565 = vrsqrt.f32 %v1418_v41  ;;  %v1417_v4 = vsub.f32 %v1413_v44, %v1415_v0 }
 0x4bc   : > { %v1419_v50 = vadd.f32 1e-05, %v1417_v4 }
 0x4be   : > { %2567 = vrsqrt.f32 %v1419_v50 }
 0x4c4   : > { %v2566_v51 = vpop.eup %2565 }
 0x4c5   : > { %v1424_v60 = vmul.f32 %v2566_v51, %v1422_v24 }
 0x4c7   : > { %v1432_v61 = vmul.f32 %v1971_v55, %v1424_v60 }
 0x4c8   : > { %v2568_v62 = vpop.eup %2567 }
 0x4c9   : > { %v1440_v38 = vadd.f32 %v1972_v7, %v1432_v61  ;;  %v1425_v49 = vmul.f32 %v2568_v62, %v1423_v8 }
 0x4cb   : > { %1583 = vmatmul.mubr.f32.vlgmr.msra.gmra.mrb[18].mxu0 %v1440_v38  ;;  %v1433_v63 = vmul.f32 %v1971_v55, %v1425_v49 }
 0x4cc   : > { %1588 = vmatprep.mubr.f32.mxu0 %v3054_v48  ;;  %v1501_v48 = vld [vmem:[#allocation20 + $0xd8] sm:$0xff] }
 0x4cd   : > { %v1441_v45 = vadd.f32 %v1972_v7, %v1433_v63  ;;  %v2309_v53 = vpack.c.bf16 %v1501_v48, %v1500_v42 }
 0x4cf   : > { %1589 = vmatmul.mubr.f32.gmra.mrb[20].mxu0 %v1441_v45  ;;  %2310 = vmatprep.subr.bf16.mxu1 %v2309_v53 }
 0x4d0   : > { %2312 = vmatpush3.bf16.msra.mxu1 %v2311_v43 }
 0x4d1   : > { %2314 = vmatprep.subr.bf16.mxu1 %v2313_v5 }
 0x4d4   : > { %2316 = vmatpush3.bf16.msra.mxu1 %v2315_v9 }
 0x4d5   : > { %2318 = vmatprep.subr.bf16.mxu1 %v2317_v14 }
 0x4d8   : > { %2320 = vmatpush3.bf16.msra.mxu1 %v2319_v22 }
 0x59e   : > { %v1584_v32 = vpop.f32.mrb[18].mxu0 }
 0x59f   : > { %v1585_v34 = vadd.f32 %v1584_v32, %v1511_v20  ;;  %v1586_v58 = vpop.f32.mrb[19].mxu0 }
 0x5a0   : > { %v1587_v2 = vadd.f32 %v1586_v58, %v1515_v21 }
 0x5a1   : > { %v1599_v31 = vmul.f32 0.70710677, %v1585_v34  ;;  %v1595_v7 = vmul.f32 0.5, %v1585_v34 }
 0x5a2   : > { %v1600_v36 = vmul.f32 0.70710677, %v1587_v2  ;;  %v1590_v1 = vpop.f32.mrb[20].mxu0  ;;  %v1596_v55 = vmul.f32 0.5, %v1587_v2 }
 0x5a3   : > { %2569 = verf.f32 %v1599_v31  ;;  %v1591_v3 = vadd.f32 %v1590_v1, %v1511_v20  ;;  %v1592_v0 = vpop.f32.mrb[21].mxu0 }
 0x5a4   : > { %2571 = verf.f32 %v1600_v36  ;;  %v1593_v41 = vadd.f32 %v1592_v0, %v1515_v21 }
 0x5a5   : > { %v1601_v44 = vmul.f32 0.70710677, %v1591_v3  ;;  %v1597_v56 = vmul.f32 0.5, %v1591_v3 }
 0x5a6   : > { %v1602_v4 = vmul.f32 0.70710677, %v1593_v41  ;;  %v1598_v63 = vmul.f32 0.5, %v1593_v41 }
 0x5a7   : > { %2573 = verf.f32 %v1601_v44 }
 0x5a8   : > { %2575 = verf.f32 %v1602_v4 }
 0x5ad   : > { %v2570_v50 = vpop.eup %2569 }
 0x5ae   : > { %v2572_v24 = vpop.eup %2571  ;;  %v1607_v51 = vadd.f32 1.0, %v2570_v50 }
 0x5af   : > { %v1608_v60 = vadd.f32 1.0, %v2572_v24 }
 0x5b0   : > { %v1611_v38 = vmul.f32 %v1607_v51, %v1595_v7 }
 0x5b1   : > { %v2574_v8 = vpop.eup %2573  ;;  %v1612_v61 = vmul.f32 %v1608_v60, %v1596_v55 }
 0x5b2   : > { %v2576_v62 = vpop.eup %2575  ;;  %v1609_v49 = vadd.f32 1.0, %v2574_v8 }
 0x5b3   : > { %v1610_v45 = vadd.f32 1.0, %v2576_v62  ;;  %1686 = vmatprep.mubr.f32.mxu1 %v1612_v61 }
 0x5b4   : > { %1687 = vmatmul.mubr.f32.vlgmr.msra.gmra.mrb[18].mxu1 %v1611_v38  ;;  %v1613_v6 = vmul.f32 %v1609_v49, %v1597_v56 }
 0x5b5   : > { %v1614_v26 = vmul.f32 %v1610_v45, %v1598_v63 }
 0x5b7   : > { %1691 = vmatprep.mubr.f32.mxu1 %v1614_v26 }
 0x5b8   : > { %1692 = vmatmul.mubr.f32.gmra.mrb[20].mxu1 %v1613_v6 }
 0x687   : > { %v2081_v11 = vpop.f32.mrb[18].mxu1 }
 0x688   : > { %v2082_v57 = vpop.f32.mrb[19].mxu1 }
 0x689   : > { %v2083_v39 = vadd.f32 %v2082_v57, %v2081_v11 }
 0x68b   : > { %v1689_v23 = vadd.f32 %v2083_v39, %v1973_v12  ;;  %v2084_v33 = vpop.f32.mrb[20].mxu1 }
 0x68c   : > { %v2085_v10 = vpop.f32.mrb[21].mxu1 }
 0x68d   : > { %v1697_v28 = vadd.f32 %v1689_v23, %v3746_v17  ;;  %v2086_v37 = vadd.f32 %v2085_v10, %v2084_v33 }
 0x68f   : > { %1699 = vst [vmem:[%s614_s2] sm:$0xff] %v1697_v28  ;;  %v1694_v42 = vadd.f32 %v2086_v37, %v1973_v12 }
 0x691   : > { %v1698_v48 = vadd.f32 %v1694_v42, %v3749_v16 }
 0x693   : > { %1700 = vst [vmem:[%s614_s2 + $0x8] sm:$0xff] %v1698_v48 }
 0x694   : > { %2956 = shalt.err (!%p2953_p7)
}
 0x695   : > { %s2957_s15 = scalar_lea.hbm %s3769_s17, 256  ;;  %s2961_s24 = scalar_lea.hbm %s3877_s0, 512 }
 0x696   : > { %p2958_p6 = scmp.ne.s32.totalorder %s3769_s17, %s2957_s15  ;;  %p2962_p13 = scmp.lt.u32.totalorder %s3769_s17, %s3877_s0 }
 0x697   : > { %p2963_p1 = scmp.lt.u32.totalorder %s2961_s24, %s2957_s15  ;;  %p2965_p2 = scmp.lt.u32.totalorder %s2957_s15, %s3769_s17 }
 0x698   : > { %p2959_p9 = pnand %p2958_p6, %p3878_p8 }
 0x699   : > { %p2964_p3 = por %p2963_p1, %p2962_p13 }
 0x69a   : > { %p2960_p4 = pneg %p2959_p9 }
 0x69b   : > { %p2966_p10 = por %p2965_p2, %p2964_p3 }
 0x69d   : > { %p2967_p11 = pnand %p2966_p10, %p2960_p4 }
 0x69f   : > { %2970 = shalt.err (!%p2967_p11)
}
 0x6a0   : > { %s3056_s29 = smov 128   ;;  %s3057_s14 = smov 8  }
 0x6a1   : > { %2371 = dma.vmem_to_hbm [thread:$0]  (%p3878_p8), %s3764_s3, 256, %s3769_s17, %s1702_s1, %s3056_s29, %s3056_s29, %s3057_s14  }
 0x6a2 PF: > { %s1730_s23 = sand.u32 1, %s3021_s25   ;;  %p3879_p12 = scmp.ne.s32.totalorder %s3860_s30, 0 }
 0x6a3   : > { %p3880_p0 = scmp.ge.s32.totalorder %s3033_s28, 2  ;;  %s1731_s16 = scalar_lea.sflag [#allocation4], %s1730_s23 }
 0x6a5   : > { %p2415_p5 = pnand %p3880_p0, %p3879_p12 }
 0x6a7   : > { %3016 = dma.done.wait (!%p2415_p5), %s1731_s16, 256  }
 0x6a8   : > { %3018 = vsyncadd (!%p2415_p5), %s1731_s16, 4294967040  ;;  %p32_p7 = scmp.ge.s32.totalorder %s3419_s18, 4   ;;  %s3881_s25 = smov %s3025_s26 }
 0x6a9   : > { %s3882_s26 = smov %s3029_s27  ;;  %s3883_s27 = smov %s3430_s19 }
 0x6aa   : > { %s3884_s28 = smov %s3419_s18  ;;  %34 = sbr.rel (!%p32_p7) target bundleno = 19 (0x13), region = 165 }
 0x6b1   :  { %1736 = vsyncpa [#allocation3], 1 }
 0x6b2   :  { %1738 = vsyncpa [#allocation3 + $0x1], 1 }
 0x6b3   :  { %1739 = vsyncpa [#allocation6], 1 }
 0x6b4   :  { %1740 = vsyncpa [#allocation9], 1 }
 0x6b5   :  { %1741 = vsyncpa [#allocation12], 1 }
 0x6b6   :  { %1742 = vsyncpa [#allocation15], 1 }
 0x6b7   :  { %1743 = vsyncpa [#allocation18], 1 }
 0x6b8   :  { %1744 = vsyncpa [#allocation21], 1 }
 0x6b9   :  { %1745 = vsyncpa [#allocation4], 1 }
 0x6ba   :  { %1747 = vsyncpa [#allocation4 + $0x1], 1 }

</bundles_post_ra>
